<compile_context>
chip_gen: v6e
topology: v6e:2x2x1
jax: 0.10.0
libtpu: 0.0.40
codegen_flags: <defaults>
</compile_context>

<pallas_src>
import math

import jax
import jax.numpy as jnp
from jax.experimental import pallas as pl
from jax.experimental.pallas import tpu as pltpu

# ----------------------------- config (small) -------------------------------
VOCAB = 100
HIDDEN = 32
HEADS = 2
HEAD_DIM = HIDDEN // HEADS
LAYERS = 2
INTERMEDIATE = 64
MAX_POS = 40
SEQ = 8
BATCH = 2              # Model.predict requires an even batch
LN_EPS = 1e-5
PAD_ID = 0
OUT_LANES = 128        # lane-dense head output; column 0 carries the logit
DTYPE = jnp.float32
MM_DTYPE = jnp.bfloat16   # matmul operand dtype (accumulation stays f32)


# ------------------------------ fused kernel ---------------------------------
def _xlmr_forward_kernel(emb_ref, bias_ref, eln_ref,
                         qkvw_ref, qkvb_ref, ow_ref, w1_ref, b1_ref, w2_ref,
                         lnv_ref, hw_ref, hb_ref, out_ref):
    """Whole forward in one invocation (no grid): embedding LayerNorm ->
    LAYERS x (MHSA + FFN, post-LN residuals) -> per-token linear + sigmoid."""

    def layernorm(h, g, b):
        mu = jnp.mean(h, axis=-1, keepdims=True)
        var = jnp.mean((h - mu) ** 2, axis=-1, keepdims=True)
        return (h - mu) * jax.lax.rsqrt(var + LN_EPS) * g + b

    eln = eln_ref[...]                                   # (2, HIDDEN): gamma, beta
    x = layernorm(emb_ref[...], eln[0:1], eln[1:2])      # (BS, HIDDEN) f32
    bias = bias_ref[...]                                 # (HEADS*BS, BS) additive

    BS = x.shape[0]
    lane = jax.lax.broadcasted_iota(jnp.int32, (1, HIDDEN), 1)
    head_masks = [((lane >= h * HEAD_DIM) & (lane < (h + 1) * HEAD_DIM))
                  .astype(jnp.float32) for h in range(HEADS)]

    for l in range(LAYERS):                              # static unroll
        # coalesced per-layer vectors: [o_b, ln1_g, ln1_b, b2, ln2_g, ln2_b]
        lnv = lnv_ref[l]                                 # (6, HIDDEN) f32

        # fused QKV projection: one 96-lane-wide MXU push.
        # 1/sqrt(HEAD_DIM) is pre-folded into the Q third of qkv_w / qkv_b.
        qkv = jnp.dot(x.astype(MM_DTYPE), qkvw_ref[l],
                      preferred_element_type=jnp.float32) + qkvb_ref[l]
        q = qkv[:, 0 * HIDDEN:1 * HIDDEN]
        k = qkv[:, 1 * HIDDEN:2 * HIDDEN]
        v = qkv[:, 2 * HIDDEN:3 * HIDDEN]

        # both heads' scores in ONE matmul: stack head-masked Q along sublanes.
        q_stack = jnp.concatenate([q * m for m in head_masks], axis=0)  # (H*BS, HIDDEN)
        s = jax.lax.dot_general(q_stack.astype(MM_DTYPE), k.astype(MM_DTYPE),
                                (((1,), (1,)), ((), ())),
                                preferred_element_type=jnp.float32)     # (H*BS, BS)
        s = s + bias
        m_max = jnp.max(s, axis=-1, keepdims=True)
        p = jnp.exp(s - m_max)
        p = p * pl.reciprocal(jnp.sum(p, axis=-1, keepdims=True), approx=True)

        # single context matmul; fold head-stacked rows back into merged-head lanes.
        ctx_stack = jnp.dot(p.astype(MM_DTYPE), v.astype(MM_DTYPE),
                            preferred_element_type=jnp.float32)         # (H*BS, HIDDEN)
        ctx = ctx_stack[0:BS] * head_masks[0]
        for h in range(1, HEADS):
            ctx = ctx + ctx_stack[h * BS:(h + 1) * BS] * head_masks[h]

        attn = jnp.dot(ctx.astype(MM_DTYPE), ow_ref[l],
                       preferred_element_type=jnp.float32) + lnv[0:1]
        x = layernorm(attn + x, lnv[1:2], lnv[2:3])      # post-LN residual

        h1 = jnp.dot(x.astype(MM_DTYPE), w1_ref[l],
                     preferred_element_type=jnp.float32) + b1_ref[l]
        # TODO(synk): HF xlm-roberta uses erf-based gelu; tanh approximation used here.
        h1 = jax.nn.gelu(h1, approximate=True)
        h2 = jnp.dot(h1.astype(MM_DTYPE), w2_ref[l],
                     preferred_element_type=jnp.float32) + lnv[3:4]
        x = layernorm(h2 + x, lnv[4:5], lnv[5:6])

    # per-token head into a lane-dense (BS, 128) slab (unmasked store).
    # nn.Dropout(0.2) is identity in eval mode (model.eval() in prediction()).
    logits = jnp.dot(x.astype(MM_DTYPE), hw_ref[...],
                     preferred_element_type=jnp.float32) + hb_ref[...]
    out_ref[...] = jax.nn.sigmoid(logits).astype(out_ref.dtype)


# --------------------------- parameter creation ------------------------------
def init_params(key):
    def nrm(k, shape):
        return (0.02 * jax.random.normal(k, shape)).astype(jnp.float32)

    ks = iter(jax.random.split(key, 4 + LAYERS * 6))
    scale = 1.0 / math.sqrt(HEAD_DIM)

    word_emb = nrm(next(ks), (VOCAB, HIDDEN))
    pos_emb = nrm(next(ks), (MAX_POS, HIDDEN))
    type_emb = nrm(next(ks), (1, HIDDEN))
    head_col = nrm(next(ks), (HIDDEN,))

    qkv_w, o_w, w1, w2 = [], [], [], []
    for _ in range(LAYERS):
        qw = nrm(next(ks), (HIDDEN, HIDDEN))
        kw = nrm(next(ks), (HIDDEN, HIDDEN))
        vw = nrm(next(ks), (HIDDEN, HIDDEN))
        qkv_w.append(jnp.concatenate([qw * scale, kw, vw], axis=-1))
        o_w.append(nrm(next(ks), (HIDDEN, HIDDEN)))
        w1.append(nrm(next(ks), (HIDDEN, INTERMEDIATE)))
        w2.append(nrm(next(ks), (INTERMEDIATE, HIDDEN)))

    # coalesced per-layer vectors: rows = [o_b, ln1_g, ln1_b, b2, ln2_g, ln2_b]
    lnv_one = jnp.stack([jnp.zeros((HIDDEN,)), jnp.ones((HIDDEN,)),
                         jnp.zeros((HIDDEN,)), jnp.zeros((HIDDEN,)),
                         jnp.ones((HIDDEN,)), jnp.zeros((HIDDEN,))]).astype(DTYPE)

    head_w = jnp.zeros((HIDDEN, OUT_LANES), DTYPE).at[:, 0].set(head_col)

    return {
        "word_emb": word_emb, "pos_emb": pos_emb, "type_emb": type_emb,
        "eln": jnp.stack([jnp.ones((HIDDEN,)),
                          jnp.zeros((HIDDEN,))]).astype(DTYPE),
        # matmul weights stored in bf16 (f32 accumulation in-kernel)
        "qkv_w": jnp.stack(qkv_w).astype(MM_DTYPE),     # (L, H, 3H), Q pre-scaled
        "qkv_b": jnp.zeros((LAYERS, 1, 3 * HIDDEN), DTYPE),
        "o_w": jnp.stack(o_w).astype(MM_DTYPE),
        "w1": jnp.stack(w1).astype(MM_DTYPE),
        "b1": jnp.zeros((LAYERS, 1, INTERMEDIATE), DTYPE),
        "w2": jnp.stack(w2).astype(MM_DTYPE),
        "lnv": jnp.tile(lnv_one[None], (LAYERS, 1, 1)),
        "head_w": head_w.astype(MM_DTYPE),              # lane-padded to 128
        "head_b": jnp.zeros((1, OUT_LANES), DTYPE),
    }


# ------------------------------- forward -------------------------------------
def model_forward(params, src, mask_src):
    """Equivalent of Model.forward(src, seg, mask_src) in eval mode."""
    B, S = src.shape
    BS = B * S

    # RoBERTa-style position ids (padding_idx = 1)
    pos_ids = jnp.cumsum(mask_src, axis=1) * mask_src + 1

    # embedding gathers are JAX glue; everything else runs inside the kernel
    emb = (params["word_emb"][src]
           + params["pos_emb"][pos_ids]
           + params["type_emb"][0])
    emb = emb.reshape(BS, HIDDEN).astype(DTYPE)

    # additive attention bias: block-diagonal over batches + key padding,
    # tiled over heads to match the sublane-stacked score layout in-kernel.
    # TODO(synk): at real (B, S) this O((B*S)^2) bias must become per-batch
    # tiles + a (B, S) key mask (it would not fit VMEM at scale).
    batch_id = jnp.arange(BS, dtype=jnp.int32) // S
    key_ok = mask_src.reshape(BS) != 0
    allowed = (batch_id[:, None] == batch_id[None, :]) & key_ok[None, :]
    attn_bias = jnp.where(allowed, 0.0, -1e9).astype(DTYPE)
    attn_bias = jnp.tile(attn_bias, (HEADS, 1))          # (HEADS*BS, BS)

    n_in = 12
    out = pl.pallas_call(
        _xlmr_forward_kernel,
        out_shape=jax.ShapeDtypeStruct((BS, OUT_LANES), DTYPE),
        in_specs=[pl.BlockSpec(memory_space=pltpu.MemorySpace.VMEM)] * n_in,
        out_specs=pl.BlockSpec(memory_space=pltpu.MemorySpace.VMEM),
    )(emb, attn_bias, params["eln"],
      params["qkv_w"], params["qkv_b"], params["o_w"],
      params["w1"], params["b1"], params["w2"],
      params["lnv"], params["head_w"], params["head_b"])

    # [CLS] probability = column 0 of row b*S; squeeze -> (B,)
    return out[:, 0].reshape(B, S)[:, 0]


# -------------------------------- main ---------------------------------------
if __name__ == "__main__":
    key = jax.random.PRNGKey(0)
    pkey, dkey = jax.random.split(key)

    params = init_params(pkey)

    # synthetic token ids with a couple of PAD (=0) positions
    src = jax.random.randint(dkey, (BATCH, SEQ), 2, VOCAB, dtype=jnp.int32)
    src = src.at[0, SEQ - 2:].set(PAD_ID)
    mask_src = (src != PAD_ID).astype(jnp.int32)   # 0 + (src != PAD_ID)

    probs = jax.jit(model_forward)(params, src, mask_src)
    jax.block_until_ready(probs)

    assert probs.shape == (BATCH,)
    assert bool(jnp.all((probs >= 0.0) & (probs <= 1.0)))
    print("KERNEL_OK")
</pallas_src>

<mosaic_0001>
module attributes {stable_mosaic.version = 11 : i64} {
  func.func @_xlmr_forward_kernel(%arg0: memref<16x32xf32, #tpu.memory_space<vmem>>, %arg1: memref<32x16xf32, #tpu.memory_space<vmem>>, %arg2: memref<2x32xf32, #tpu.memory_space<vmem>>, %arg3: memref<2x32x96xbf16, #tpu.memory_space<vmem>>, %arg4: memref<2x1x96xf32, #tpu.memory_space<vmem>>, %arg5: memref<2x32x32xbf16, #tpu.memory_space<vmem>>, %arg6: memref<2x32x64xbf16, #tpu.memory_space<vmem>>, %arg7: memref<2x1x64xf32, #tpu.memory_space<vmem>>, %arg8: memref<2x64x32xbf16, #tpu.memory_space<vmem>>, %arg9: memref<2x6x32xf32, #tpu.memory_space<vmem>>, %arg10: memref<32x128xbf16, #tpu.memory_space<vmem>>, %arg11: memref<1x128xf32, #tpu.memory_space<vmem>>, %arg12: memref<16x128xf32, #tpu.memory_space<vmem>>) attributes {dimension_semantics = [], scalar_prefetch = 0 : i64, scratch_operands = 0 : i64, tpu.core_type = #tpu.core_type<tc>} {
    %c0 = arith.constant 0 : index
    %c0_0 = arith.constant 0 : index
    %0 = vector.load %arg2[%c0, %c0_0] : memref<2x32xf32, #tpu.memory_space<vmem>>, vector<2x32xf32>
    %c0_1 = arith.constant 0 : index
    %c0_2 = arith.constant 0 : index
    %1 = vector.load %arg0[%c0_1, %c0_2] : memref<16x32xf32, #tpu.memory_space<vmem>>, vector<16x32xf32>
    %2 = vector.extract_strided_slice %0 {offsets = [0, 0], sizes = [1, 32], strides = [1, 1]} : vector<2x32xf32> to vector<1x32xf32>
    %3 = vector.extract_strided_slice %0 {offsets = [1, 0], sizes = [1, 32], strides = [1, 1]} : vector<2x32xf32> to vector<1x32xf32>
    %cst = arith.constant dense<0.000000e+00> : vector<16xf32>
    %4 = vector.multi_reduction <add>, %1, %cst [1] : vector<16x32xf32> to vector<16xf32>
    %5 = vector.shape_cast %4 : vector<16xf32> to vector<16x1xf32>
    %cst_3 = arith.constant 3.200000e+01 : f32
    %6 = vector.broadcast %cst_3 : f32 to vector<16x1xf32>
    %7 = arith.divf %5, %6 : vector<16x1xf32>
    %8 = vector.broadcast %7 : vector<16x1xf32> to vector<16x32xf32>
    %9 = arith.subf %1, %8 : vector<16x32xf32>
    %10 = arith.mulf %9, %9 : vector<16x32xf32>
    %cst_4 = arith.constant dense<0.000000e+00> : vector<16xf32>
    %11 = vector.multi_reduction <add>, %10, %cst_4 [1] : vector<16x32xf32> to vector<16xf32>
    %12 = vector.shape_cast %11 : vector<16xf32> to vector<16x1xf32>
    %cst_5 = arith.constant 3.200000e+01 : f32
    %13 = vector.broadcast %cst_5 : f32 to vector<16x1xf32>
    %14 = arith.divf %12, %13 : vector<16x1xf32>
    %15 = vector.broadcast %7 : vector<16x1xf32> to vector<16x32xf32>
    %16 = arith.subf %1, %15 : vector<16x32xf32>
    %cst_6 = arith.constant 9.99999974E-6 : f32
    %17 = vector.broadcast %cst_6 : f32 to vector<16x1xf32>
    %18 = arith.addf %14, %17 : vector<16x1xf32>
    %19 = math.rsqrt %18 : vector<16x1xf32>
    %20 = vector.broadcast %19 : vector<16x1xf32> to vector<16x32xf32>
    %21 = arith.mulf %16, %20 : vector<16x32xf32>
    %22 = vector.broadcast %2 : vector<1x32xf32> to vector<16x32xf32>
    %23 = arith.mulf %21, %22 : vector<16x32xf32>
    %24 = vector.broadcast %3 : vector<1x32xf32> to vector<16x32xf32>
    %25 = arith.addf %23, %24 : vector<16x32xf32>
    %c0_7 = arith.constant 0 : index
    %c0_8 = arith.constant 0 : index
    %26 = vector.load %arg1[%c0_7, %c0_8] : memref<32x16xf32, #tpu.memory_space<vmem>>, vector<32x16xf32>
    %27 = tpu.iota {dimensions = array<i32: 1>} : vector<1x32xi32>
    %c0_i32 = arith.constant 0 : i32
    %28 = vector.broadcast %c0_i32 : i32 to vector<1x32xi32>
    %29 = arith.cmpi sge, %27, %28 : vector<1x32xi32>
    %c16_i32 = arith.constant 16 : i32
    %30 = vector.broadcast %c16_i32 : i32 to vector<1x32xi32>
    %31 = arith.cmpi slt, %27, %30 : vector<1x32xi32>
    %32 = arith.andi %29, %31 : vector<1x32xi1>
    %33 = arith.extui %32 : vector<1x32xi1> to vector<1x32xi32>
    %34 = arith.sitofp %33 : vector<1x32xi32> to vector<1x32xf32>
    %c16_i32_9 = arith.constant 16 : i32
    %35 = vector.broadcast %c16_i32_9 : i32 to vector<1x32xi32>
    %36 = arith.cmpi sge, %27, %35 : vector<1x32xi32>
    %c32_i32 = arith.constant 32 : i32
    %37 = vector.broadcast %c32_i32 : i32 to vector<1x32xi32>
    %38 = arith.cmpi slt, %27, %37 : vector<1x32xi32>
    %39 = arith.andi %36, %38 : vector<1x32xi1>
    %40 = arith.extui %39 : vector<1x32xi1> to vector<1x32xi32>
    %41 = arith.sitofp %40 : vector<1x32xi32> to vector<1x32xf32>
    %c0_10 = arith.constant 0 : index
    %c0_11 = arith.constant 0 : index
    %c0_12 = arith.constant 0 : index
    %42 = vector.load %arg9[%c0_10, %c0_11, %c0_12] : memref<2x6x32xf32, #tpu.memory_space<vmem>>, vector<1x6x32xf32>
    %43 = vector.shape_cast %42 : vector<1x6x32xf32> to vector<6x32xf32>
    %44 = arith.truncf %25 : vector<16x32xf32> to vector<16x32xbf16>
    %c0_13 = arith.constant 0 : index
    %c0_14 = arith.constant 0 : index
    %c0_15 = arith.constant 0 : index
    %45 = vector.load %arg3[%c0_13, %c0_14, %c0_15] : memref<2x32x96xbf16, #tpu.memory_space<vmem>>, vector<1x32x96xbf16>
    %46 = vector.shape_cast %45 : vector<1x32x96xbf16> to vector<32x96xbf16>
    %cst_16 = arith.constant dense<0.000000e+00> : vector<16x96xf32>
    %47 = tpu.matmul %44, %46, %cst_16 {dimension_numbers = #tpu.dot_dimension_numbers<[1], [0], [0], [1], [0, 0, 1, 1], [], []>} : vector<16x32xbf16>, vector<32x96xbf16>, vector<16x96xf32> -> vector<16x96xf32>
    %c0_17 = arith.constant 0 : index
    %c0_18 = arith.constant 0 : index
    %c0_19 = arith.constant 0 : index
    %48 = vector.load %arg4[%c0_17, %c0_18, %c0_19] : memref<2x1x96xf32, #tpu.memory_space<vmem>>, vector<1x1x96xf32>
    %49 = vector.shape_cast %48 : vector<1x1x96xf32> to vector<1x96xf32>
    %50 = vector.broadcast %49 : vector<1x96xf32> to vector<16x96xf32>
    %51 = arith.addf %47, %50 : vector<16x96xf32>
    %52 = vector.extract_strided_slice %51 {offsets = [0, 0], sizes = [16, 32], strides = [1, 1]} : vector<16x96xf32> to vector<16x32xf32>
    %53 = vector.extract_strided_slice %51 {offsets = [0, 32], sizes = [16, 32], strides = [1, 1]} : vector<16x96xf32> to vector<16x32xf32>
    %54 = vector.extract_strided_slice %51 {offsets = [0, 64], sizes = [16, 32], strides = [1, 1]} : vector<16x96xf32> to vector<16x32xf32>
    %55 = vector.broadcast %34 : vector<1x32xf32> to vector<16x32xf32>
    %56 = arith.mulf %52, %55 : vector<16x32xf32>
    %57 = vector.broadcast %41 : vector<1x32xf32> to vector<16x32xf32>
    %58 = arith.mulf %52, %57 : vector<16x32xf32>
    %59 = tpu.concatenate %56, %58 in 0 : vector<16x32xf32>, vector<16x32xf32> -> vector<32x32xf32>
    %60 = arith.truncf %59 : vector<32x32xf32> to vector<32x32xbf16>
    %61 = arith.truncf %53 : vector<16x32xf32> to vector<16x32xbf16>
    %cst_20 = arith.constant dense<0.000000e+00> : vector<32x16xf32>
    %62 = tpu.matmul %60, %61, %cst_20 {dimension_numbers = #tpu.dot_dimension_numbers<[1], [1], [0], [0], [0, 0, 1, 0], [], []>} : vector<32x32xbf16>, vector<16x32xbf16>, vector<32x16xf32> -> vector<32x16xf32>
    %63 = arith.addf %62, %26 : vector<32x16xf32>
    %cst_21 = arith.constant dense<0xFF800000> : vector<32xf32>
    %64 = vector.multi_reduction <maximumf>, %63, %cst_21 [1] : vector<32x16xf32> to vector<32xf32>
    %65 = vector.shape_cast %64 : vector<32xf32> to vector<32x1xf32>
    %66 = vector.broadcast %65 : vector<32x1xf32> to vector<32x16xf32>
    %67 = arith.subf %63, %66 : vector<32x16xf32>
    %68 = math.exp %67 : vector<32x16xf32>
    %cst_22 = arith.constant dense<0.000000e+00> : vector<32xf32>
    %69 = vector.multi_reduction <add>, %68, %cst_22 [1] : vector<32x16xf32> to vector<32xf32>
    %70 = vector.shape_cast %69 : vector<32xf32> to vector<32x1xf32>
    %71 = tpu.reciprocal %70 {approx = true} : vector<32x1xf32> -> vector<32x1xf32>
    %72 = vector.broadcast %71 : vector<32x1xf32> to vector<32x16xf32>
    %73 = arith.mulf %68, %72 : vector<32x16xf32>
    %74 = arith.truncf %73 : vector<32x16xf32> to vector<32x16xbf16>
    %75 = arith.truncf %54 : vector<16x32xf32> to vector<16x32xbf16>
    %cst_23 = arith.constant dense<0.000000e+00> : vector<32x32xf32>
    %76 = tpu.matmul %74, %75, %cst_23 {dimension_numbers = #tpu.dot_dimension_numbers<[1], [0], [0], [1], [0, 0, 1, 1], [], []>} : vector<32x16xbf16>, vector<16x32xbf16>, vector<32x32xf32> -> vector<32x32xf32>
    %77 = vector.extract_strided_slice %76 {offsets = [0, 0], sizes = [16, 32], strides = [1, 1]} : vector<32x32xf32> to vector<16x32xf32>
    %78 = vector.broadcast %34 : vector<1x32xf32> to vector<16x32xf32>
    %79 = arith.mulf %77, %78 : vector<16x32xf32>
    %80 = vector.extract_strided_slice %76 {offsets = [16, 0], sizes = [16, 32], strides = [1, 1]} : vector<32x32xf32> to vector<16x32xf32>
    %81 = vector.broadcast %41 : vector<1x32xf32> to vector<16x32xf32>
    %82 = arith.mulf %80, %81 : vector<16x32xf32>
    %83 = arith.addf %79, %82 : vector<16x32xf32>
    %84 = arith.truncf %83 : vector<16x32xf32> to vector<16x32xbf16>
    %c0_24 = arith.constant 0 : index
    %c0_25 = arith.constant 0 : index
    %c0_26 = arith.constant 0 : index
    %85 = vector.load %arg5[%c0_24, %c0_25, %c0_26] : memref<2x32x32xbf16, #tpu.memory_space<vmem>>, vector<1x32x32xbf16>
    %86 = vector.shape_cast %85 : vector<1x32x32xbf16> to vector<32x32xbf16>
    %cst_27 = arith.constant dense<0.000000e+00> : vector<16x32xf32>
    %87 = tpu.matmul %84, %86, %cst_27 {dimension_numbers = #tpu.dot_dimension_numbers<[1], [0], [0], [1], [0, 0, 1, 1], [], []>} : vector<16x32xbf16>, vector<32x32xbf16>, vector<16x32xf32> -> vector<16x32xf32>
    %88 = vector.extract_strided_slice %43 {offsets = [0, 0], sizes = [1, 32], strides = [1, 1]} : vector<6x32xf32> to vector<1x32xf32>
    %89 = vector.broadcast %88 : vector<1x32xf32> to vector<16x32xf32>
    %90 = arith.addf %87, %89 : vector<16x32xf32>
    %91 = arith.addf %90, %25 : vector<16x32xf32>
    %92 = vector.extract_strided_slice %43 {offsets = [1, 0], sizes = [1, 32], strides = [1, 1]} : vector<6x32xf32> to vector<1x32xf32>
    %93 = vector.extract_strided_slice %43 {offsets = [2, 0], sizes = [1, 32], strides = [1, 1]} : vector<6x32xf32> to vector<1x32xf32>
    %cst_28 = arith.constant dense<0.000000e+00> : vector<16xf32>
    %94 = vector.multi_reduction <add>, %91, %cst_28 [1] : vector<16x32xf32> to vector<16xf32>
    %95 = vector.shape_cast %94 : vector<16xf32> to vector<16x1xf32>
    %cst_29 = arith.constant 3.200000e+01 : f32
    %96 = vector.broadcast %cst_29 : f32 to vector<16x1xf32>
    %97 = arith.divf %95, %96 : vector<16x1xf32>
    %98 = vector.broadcast %97 : vector<16x1xf32> to vector<16x32xf32>
    %99 = arith.subf %91, %98 : vector<16x32xf32>
    %100 = arith.mulf %99, %99 : vector<16x32xf32>
    %cst_30 = arith.constant dense<0.000000e+00> : vector<16xf32>
    %101 = vector.multi_reduction <add>, %100, %cst_30 [1] : vector<16x32xf32> to vector<16xf32>
    %102 = vector.shape_cast %101 : vector<16xf32> to vector<16x1xf32>
    %cst_31 = arith.constant 3.200000e+01 : f32
    %103 = vector.broadcast %cst_31 : f32 to vector<16x1xf32>
    %104 = arith.divf %102, %103 : vector<16x1xf32>
    %105 = vector.broadcast %97 : vector<16x1xf32> to vector<16x32xf32>
    %106 = arith.subf %91, %105 : vector<16x32xf32>
    %cst_32 = arith.constant 9.99999974E-6 : f32
    %107 = vector.broadcast %cst_32 : f32 to vector<16x1xf32>
    %108 = arith.addf %104, %107 : vector<16x1xf32>
    %109 = math.rsqrt %108 : vector<16x1xf32>
    %110 = vector.broadcast %109 : vector<16x1xf32> to vector<16x32xf32>
    %111 = arith.mulf %106, %110 : vector<16x32xf32>
    %112 = vector.broadcast %92 : vector<1x32xf32> to vector<16x32xf32>
    %113 = arith.mulf %111, %112 : vector<16x32xf32>
    %114 = vector.broadcast %93 : vector<1x32xf32> to vector<16x32xf32>
    %115 = arith.addf %113, %114 : vector<16x32xf32>
    %116 = arith.truncf %115 : vector<16x32xf32> to vector<16x32xbf16>
    %c0_33 = arith.constant 0 : index
    %c0_34 = arith.constant 0 : index
    %c0_35 = arith.constant 0 : index
    %117 = vector.load %arg6[%c0_33, %c0_34, %c0_35] : memref<2x32x64xbf16, #tpu.memory_space<vmem>>, vector<1x32x64xbf16>
    %118 = vector.shape_cast %117 : vector<1x32x64xbf16> to vector<32x64xbf16>
    %cst_36 = arith.constant dense<0.000000e+00> : vector<16x64xf32>
    %119 = tpu.matmul %116, %118, %cst_36 {dimension_numbers = #tpu.dot_dimension_numbers<[1], [0], [0], [1], [0, 0, 1, 1], [], []>} : vector<16x32xbf16>, vector<32x64xbf16>, vector<16x64xf32> -> vector<16x64xf32>
    %c0_37 = arith.constant 0 : index
    %c0_38 = arith.constant 0 : index
    %c0_39 = arith.constant 0 : index
    %120 = vector.load %arg7[%c0_37, %c0_38, %c0_39] : memref<2x1x64xf32, #tpu.memory_space<vmem>>, vector<1x1x64xf32>
    %121 = vector.shape_cast %120 : vector<1x1x64xf32> to vector<1x64xf32>
    %122 = vector.broadcast %121 : vector<1x64xf32> to vector<16x64xf32>
    %123 = arith.addf %119, %122 : vector<16x64xf32>
    %124 = arith.mulf %123, %123 : vector<16x64xf32>
    %125 = arith.mulf %123, %124 : vector<16x64xf32>
    %cst_40 = arith.constant 4.471500e-02 : f32
    %126 = vector.broadcast %cst_40 : f32 to vector<16x64xf32>
    %127 = arith.mulf %126, %125 : vector<16x64xf32>
    %128 = arith.addf %123, %127 : vector<16x64xf32>
    %cst_41 = arith.constant 0.797884583 : f32
    %129 = vector.broadcast %cst_41 : f32 to vector<16x64xf32>
    %130 = arith.mulf %129, %128 : vector<16x64xf32>
    %131 = math.tanh %130 : vector<16x64xf32>
    %cst_42 = arith.constant 1.000000e+00 : f32
    %132 = vector.broadcast %cst_42 : f32 to vector<16x64xf32>
    %133 = arith.addf %132, %131 : vector<16x64xf32>
    %cst_43 = arith.constant 5.000000e-01 : f32
    %134 = vector.broadcast %cst_43 : f32 to vector<16x64xf32>
    %135 = arith.mulf %134, %133 : vector<16x64xf32>
    %136 = arith.mulf %123, %135 : vector<16x64xf32>
    %137 = arith.truncf %136 : vector<16x64xf32> to vector<16x64xbf16>
    %c0_44 = arith.constant 0 : index
    %c0_45 = arith.constant 0 : index
    %c0_46 = arith.constant 0 : index
    %138 = vector.load %arg8[%c0_44, %c0_45, %c0_46] : memref<2x64x32xbf16, #tpu.memory_space<vmem>>, vector<1x64x32xbf16>
    %139 = vector.shape_cast %138 : vector<1x64x32xbf16> to vector<64x32xbf16>
    %cst_47 = arith.constant dense<0.000000e+00> : vector<16x32xf32>
    %140 = tpu.matmul %137, %139, %cst_47 {dimension_numbers = #tpu.dot_dimension_numbers<[1], [0], [0], [1], [0, 0, 1, 1], [], []>} : vector<16x64xbf16>, vector<64x32xbf16>, vector<16x32xf32> -> vector<16x32xf32>
    %141 = vector.extract_strided_slice %43 {offsets = [3, 0], sizes = [1, 32], strides = [1, 1]} : vector<6x32xf32> to vector<1x32xf32>
    %142 = vector.broadcast %141 : vector<1x32xf32> to vector<16x32xf32>
    %143 = arith.addf %140, %142 : vector<16x32xf32>
    %144 = arith.addf %143, %115 : vector<16x32xf32>
    %145 = vector.extract_strided_slice %43 {offsets = [4, 0], sizes = [1, 32], strides = [1, 1]} : vector<6x32xf32> to vector<1x32xf32>
    %146 = vector.extract_strided_slice %43 {offsets = [5, 0], sizes = [1, 32], strides = [1, 1]} : vector<6x32xf32> to vector<1x32xf32>
    %cst_48 = arith.constant dense<0.000000e+00> : vector<16xf32>
    %147 = vector.multi_reduction <add>, %144, %cst_48 [1] : vector<16x32xf32> to vector<16xf32>
    %148 = vector.shape_cast %147 : vector<16xf32> to vector<16x1xf32>
    %cst_49 = arith.constant 3.200000e+01 : f32
    %149 = vector.broadcast %cst_49 : f32 to vector<16x1xf32>
    %150 = arith.divf %148, %149 : vector<16x1xf32>
    %151 = vector.broadcast %150 : vector<16x1xf32> to vector<16x32xf32>
    %152 = arith.subf %144, %151 : vector<16x32xf32>
    %153 = arith.mulf %152, %152 : vector<16x32xf32>
    %cst_50 = arith.constant dense<0.000000e+00> : vector<16xf32>
    %154 = vector.multi_reduction <add>, %153, %cst_50 [1] : vector<16x32xf32> to vector<16xf32>
    %155 = vector.shape_cast %154 : vector<16xf32> to vector<16x1xf32>
    %cst_51 = arith.constant 3.200000e+01 : f32
    %156 = vector.broadcast %cst_51 : f32 to vector<16x1xf32>
    %157 = arith.divf %155, %156 : vector<16x1xf32>
    %158 = vector.broadcast %150 : vector<16x1xf32> to vector<16x32xf32>
    %159 = arith.subf %144, %158 : vector<16x32xf32>
    %cst_52 = arith.constant 9.99999974E-6 : f32
    %160 = vector.broadcast %cst_52 : f32 to vector<16x1xf32>
    %161 = arith.addf %157, %160 : vector<16x1xf32>
    %162 = math.rsqrt %161 : vector<16x1xf32>
    %163 = vector.broadcast %162 : vector<16x1xf32> to vector<16x32xf32>
    %164 = arith.mulf %159, %163 : vector<16x32xf32>
    %165 = vector.broadcast %145 : vector<1x32xf32> to vector<16x32xf32>
    %166 = arith.mulf %164, %165 : vector<16x32xf32>
    %167 = vector.broadcast %146 : vector<1x32xf32> to vector<16x32xf32>
    %168 = arith.addf %166, %167 : vector<16x32xf32>
    %c1 = arith.constant 1 : index
    %c0_53 = arith.constant 0 : index
    %c0_54 = arith.constant 0 : index
    %169 = vector.load %arg9[%c1, %c0_53, %c0_54] : memref<2x6x32xf32, #tpu.memory_space<vmem>>, vector<1x6x32xf32>
    %170 = vector.shape_cast %169 : vector<1x6x32xf32> to vector<6x32xf32>
    %171 = arith.truncf %168 : vector<16x32xf32> to vector<16x32xbf16>
    %c1_55 = arith.constant 1 : index
    %c0_56 = arith.constant 0 : index
    %c0_57 = arith.constant 0 : index
    %172 = vector.load %arg3[%c1_55, %c0_56, %c0_57] : memref<2x32x96xbf16, #tpu.memory_space<vmem>>, vector<1x32x96xbf16>
    %173 = vector.shape_cast %172 : vector<1x32x96xbf16> to vector<32x96xbf16>
    %cst_58 = arith.constant dense<0.000000e+00> : vector<16x96xf32>
    %174 = tpu.matmul %171, %173, %cst_58 {dimension_numbers = #tpu.dot_dimension_numbers<[1], [0], [0], [1], [0, 0, 1, 1], [], []>} : vector<16x32xbf16>, vector<32x96xbf16>, vector<16x96xf32> -> vector<16x96xf32>
    %c1_59 = arith.constant 1 : index
    %c0_60 = arith.constant 0 : index
    %c0_61 = arith.constant 0 : index
    %175 = vector.load %arg4[%c1_59, %c0_60, %c0_61] : memref<2x1x96xf32, #tpu.memory_space<vmem>>, vector<1x1x96xf32>
    %176 = vector.shape_cast %175 : vector<1x1x96xf32> to vector<1x96xf32>
    %177 = vector.broadcast %176 : vector<1x96xf32> to vector<16x96xf32>
    %178 = arith.addf %174, %177 : vector<16x96xf32>
    %179 = vector.extract_strided_slice %178 {offsets = [0, 0], sizes = [16, 32], strides = [1, 1]} : vector<16x96xf32> to vector<16x32xf32>
    %180 = vector.extract_strided_slice %178 {offsets = [0, 32], sizes = [16, 32], strides = [1, 1]} : vector<16x96xf32> to vector<16x32xf32>
    %181 = vector.extract_strided_slice %178 {offsets = [0, 64], sizes = [16, 32], strides = [1, 1]} : vector<16x96xf32> to vector<16x32xf32>
    %182 = vector.broadcast %34 : vector<1x32xf32> to vector<16x32xf32>
    %183 = arith.mulf %179, %182 : vector<16x32xf32>
    %184 = vector.broadcast %41 : vector<1x32xf32> to vector<16x32xf32>
    %185 = arith.mulf %179, %184 : vector<16x32xf32>
    %186 = tpu.concatenate %183, %185 in 0 : vector<16x32xf32>, vector<16x32xf32> -> vector<32x32xf32>
    %187 = arith.truncf %186 : vector<32x32xf32> to vector<32x32xbf16>
    %188 = arith.truncf %180 : vector<16x32xf32> to vector<16x32xbf16>
    %cst_62 = arith.constant dense<0.000000e+00> : vector<32x16xf32>
    %189 = tpu.matmul %187, %188, %cst_62 {dimension_numbers = #tpu.dot_dimension_numbers<[1], [1], [0], [0], [0, 0, 1, 0], [], []>} : vector<32x32xbf16>, vector<16x32xbf16>, vector<32x16xf32> -> vector<32x16xf32>
    %190 = arith.addf %189, %26 : vector<32x16xf32>
    %cst_63 = arith.constant dense<0xFF800000> : vector<32xf32>
    %191 = vector.multi_reduction <maximumf>, %190, %cst_63 [1] : vector<32x16xf32> to vector<32xf32>
    %192 = vector.shape_cast %191 : vector<32xf32> to vector<32x1xf32>
    %193 = vector.broadcast %192 : vector<32x1xf32> to vector<32x16xf32>
    %194 = arith.subf %190, %193 : vector<32x16xf32>
    %195 = math.exp %194 : vector<32x16xf32>
    %cst_64 = arith.constant dense<0.000000e+00> : vector<32xf32>
    %196 = vector.multi_reduction <add>, %195, %cst_64 [1] : vector<32x16xf32> to vector<32xf32>
    %197 = vector.shape_cast %196 : vector<32xf32> to vector<32x1xf32>
    %198 = tpu.reciprocal %197 {approx = true} : vector<32x1xf32> -> vector<32x1xf32>
    %199 = vector.broadcast %198 : vector<32x1xf32> to vector<32x16xf32>
    %200 = arith.mulf %195, %199 : vector<32x16xf32>
    %201 = arith.truncf %200 : vector<32x16xf32> to vector<32x16xbf16>
    %202 = arith.truncf %181 : vector<16x32xf32> to vector<16x32xbf16>
    %cst_65 = arith.constant dense<0.000000e+00> : vector<32x32xf32>
    %203 = tpu.matmul %201, %202, %cst_65 {dimension_numbers = #tpu.dot_dimension_numbers<[1], [0], [0], [1], [0, 0, 1, 1], [], []>} : vector<32x16xbf16>, vector<16x32xbf16>, vector<32x32xf32> -> vector<32x32xf32>
    %204 = vector.extract_strided_slice %203 {offsets = [0, 0], sizes = [16, 32], strides = [1, 1]} : vector<32x32xf32> to vector<16x32xf32>
    %205 = vector.broadcast %34 : vector<1x32xf32> to vector<16x32xf32>
    %206 = arith.mulf %204, %205 : vector<16x32xf32>
    %207 = vector.extract_strided_slice %203 {offsets = [16, 0], sizes = [16, 32], strides = [1, 1]} : vector<32x32xf32> to vector<16x32xf32>
    %208 = vector.broadcast %41 : vector<1x32xf32> to vector<16x32xf32>
    %209 = arith.mulf %207, %208 : vector<16x32xf32>
    %210 = arith.addf %206, %209 : vector<16x32xf32>
    %211 = arith.truncf %210 : vector<16x32xf32> to vector<16x32xbf16>
    %c1_66 = arith.constant 1 : index
    %c0_67 = arith.constant 0 : index
    %c0_68 = arith.constant 0 : index
    %212 = vector.load %arg5[%c1_66, %c0_67, %c0_68] : memref<2x32x32xbf16, #tpu.memory_space<vmem>>, vector<1x32x32xbf16>
    %213 = vector.shape_cast %212 : vector<1x32x32xbf16> to vector<32x32xbf16>
    %cst_69 = arith.constant dense<0.000000e+00> : vector<16x32xf32>
    %214 = tpu.matmul %211, %213, %cst_69 {dimension_numbers = #tpu.dot_dimension_numbers<[1], [0], [0], [1], [0, 0, 1, 1], [], []>} : vector<16x32xbf16>, vector<32x32xbf16>, vector<16x32xf32> -> vector<16x32xf32>
    %215 = vector.extract_strided_slice %170 {offsets = [0, 0], sizes = [1, 32], strides = [1, 1]} : vector<6x32xf32> to vector<1x32xf32>
    %216 = vector.broadcast %215 : vector<1x32xf32> to vector<16x32xf32>
    %217 = arith.addf %214, %216 : vector<16x32xf32>
    %218 = arith.addf %217, %168 : vector<16x32xf32>
    %219 = vector.extract_strided_slice %170 {offsets = [1, 0], sizes = [1, 32], strides = [1, 1]} : vector<6x32xf32> to vector<1x32xf32>
    %220 = vector.extract_strided_slice %170 {offsets = [2, 0], sizes = [1, 32], strides = [1, 1]} : vector<6x32xf32> to vector<1x32xf32>
    %cst_70 = arith.constant dense<0.000000e+00> : vector<16xf32>
    %221 = vector.multi_reduction <add>, %218, %cst_70 [1] : vector<16x32xf32> to vector<16xf32>
    %222 = vector.shape_cast %221 : vector<16xf32> to vector<16x1xf32>
    %cst_71 = arith.constant 3.200000e+01 : f32
    %223 = vector.broadcast %cst_71 : f32 to vector<16x1xf32>
    %224 = arith.divf %222, %223 : vector<16x1xf32>
    %225 = vector.broadcast %224 : vector<16x1xf32> to vector<16x32xf32>
    %226 = arith.subf %218, %225 : vector<16x32xf32>
    %227 = arith.mulf %226, %226 : vector<16x32xf32>
    %cst_72 = arith.constant dense<0.000000e+00> : vector<16xf32>
    %228 = vector.multi_reduction <add>, %227, %cst_72 [1] : vector<16x32xf32> to vector<16xf32>
    %229 = vector.shape_cast %228 : vector<16xf32> to vector<16x1xf32>
    %cst_73 = arith.constant 3.200000e+01 : f32
    %230 = vector.broadcast %cst_73 : f32 to vector<16x1xf32>
    %231 = arith.divf %229, %230 : vector<16x1xf32>
    %232 = vector.broadcast %224 : vector<16x1xf32> to vector<16x32xf32>
    %233 = arith.subf %218, %232 : vector<16x32xf32>
    %cst_74 = arith.constant 9.99999974E-6 : f32
    %234 = vector.broadcast %cst_74 : f32 to vector<16x1xf32>
    %235 = arith.addf %231, %234 : vector<16x1xf32>
    %236 = math.rsqrt %235 : vector<16x1xf32>
    %237 = vector.broadcast %236 : vector<16x1xf32> to vector<16x32xf32>
    %238 = arith.mulf %233, %237 : vector<16x32xf32>
    %239 = vector.broadcast %219 : vector<1x32xf32> to vector<16x32xf32>
    %240 = arith.mulf %238, %239 : vector<16x32xf32>
    %241 = vector.broadcast %220 : vector<1x32xf32> to vector<16x32xf32>
    %242 = arith.addf %240, %241 : vector<16x32xf32>
    %243 = arith.truncf %242 : vector<16x32xf32> to vector<16x32xbf16>
    %c1_75 = arith.constant 1 : index
    %c0_76 = arith.constant 0 : index
    %c0_77 = arith.constant 0 : index
    %244 = vector.load %arg6[%c1_75, %c0_76, %c0_77] : memref<2x32x64xbf16, #tpu.memory_space<vmem>>, vector<1x32x64xbf16>
    %245 = vector.shape_cast %244 : vector<1x32x64xbf16> to vector<32x64xbf16>
    %cst_78 = arith.constant dense<0.000000e+00> : vector<16x64xf32>
    %246 = tpu.matmul %243, %245, %cst_78 {dimension_numbers = #tpu.dot_dimension_numbers<[1], [0], [0], [1], [0, 0, 1, 1], [], []>} : vector<16x32xbf16>, vector<32x64xbf16>, vector<16x64xf32> -> vector<16x64xf32>
    %c1_79 = arith.constant 1 : index
    %c0_80 = arith.constant 0 : index
    %c0_81 = arith.constant 0 : index
    %247 = vector.load %arg7[%c1_79, %c0_80, %c0_81] : memref<2x1x64xf32, #tpu.memory_space<vmem>>, vector<1x1x64xf32>
    %248 = vector.shape_cast %247 : vector<1x1x64xf32> to vector<1x64xf32>
    %249 = vector.broadcast %248 : vector<1x64xf32> to vector<16x64xf32>
    %250 = arith.addf %246, %249 : vector<16x64xf32>
    %251 = arith.mulf %250, %250 : vector<16x64xf32>
    %252 = arith.mulf %250, %251 : vector<16x64xf32>
    %cst_82 = arith.constant 4.471500e-02 : f32
    %253 = vector.broadcast %cst_82 : f32 to vector<16x64xf32>
    %254 = arith.mulf %253, %252 : vector<16x64xf32>
    %255 = arith.addf %250, %254 : vector<16x64xf32>
    %cst_83 = arith.constant 0.797884583 : f32
    %256 = vector.broadcast %cst_83 : f32 to vector<16x64xf32>
    %257 = arith.mulf %256, %255 : vector<16x64xf32>
    %258 = math.tanh %257 : vector<16x64xf32>
    %cst_84 = arith.constant 1.000000e+00 : f32
    %259 = vector.broadcast %cst_84 : f32 to vector<16x64xf32>
    %260 = arith.addf %259, %258 : vector<16x64xf32>
    %cst_85 = arith.constant 5.000000e-01 : f32
    %261 = vector.broadcast %cst_85 : f32 to vector<16x64xf32>
    %262 = arith.mulf %261, %260 : vector<16x64xf32>
    %263 = arith.mulf %250, %262 : vector<16x64xf32>
    %264 = arith.truncf %263 : vector<16x64xf32> to vector<16x64xbf16>
    %c1_86 = arith.constant 1 : index
    %c0_87 = arith.constant 0 : index
    %c0_88 = arith.constant 0 : index
    %265 = vector.load %arg8[%c1_86, %c0_87, %c0_88] : memref<2x64x32xbf16, #tpu.memory_space<vmem>>, vector<1x64x32xbf16>
    %266 = vector.shape_cast %265 : vector<1x64x32xbf16> to vector<64x32xbf16>
    %cst_89 = arith.constant dense<0.000000e+00> : vector<16x32xf32>
    %267 = tpu.matmul %264, %266, %cst_89 {dimension_numbers = #tpu.dot_dimension_numbers<[1], [0], [0], [1], [0, 0, 1, 1], [], []>} : vector<16x64xbf16>, vector<64x32xbf16>, vector<16x32xf32> -> vector<16x32xf32>
    %268 = vector.extract_strided_slice %170 {offsets = [3, 0], sizes = [1, 32], strides = [1, 1]} : vector<6x32xf32> to vector<1x32xf32>
    %269 = vector.broadcast %268 : vector<1x32xf32> to vector<16x32xf32>
    %270 = arith.addf %267, %269 : vector<16x32xf32>
    %271 = arith.addf %270, %242 : vector<16x32xf32>
    %272 = vector.extract_strided_slice %170 {offsets = [4, 0], sizes = [1, 32], strides = [1, 1]} : vector<6x32xf32> to vector<1x32xf32>
    %273 = vector.extract_strided_slice %170 {offsets = [5, 0], sizes = [1, 32], strides = [1, 1]} : vector<6x32xf32> to vector<1x32xf32>
    %cst_90 = arith.constant dense<0.000000e+00> : vector<16xf32>
    %274 = vector.multi_reduction <add>, %271, %cst_90 [1] : vector<16x32xf32> to vector<16xf32>
    %275 = vector.shape_cast %274 : vector<16xf32> to vector<16x1xf32>
    %cst_91 = arith.constant 3.200000e+01 : f32
    %276 = vector.broadcast %cst_91 : f32 to vector<16x1xf32>
    %277 = arith.divf %275, %276 : vector<16x1xf32>
    %278 = vector.broadcast %277 : vector<16x1xf32> to vector<16x32xf32>
    %279 = arith.subf %271, %278 : vector<16x32xf32>
    %280 = arith.mulf %279, %279 : vector<16x32xf32>
    %cst_92 = arith.constant dense<0.000000e+00> : vector<16xf32>
    %281 = vector.multi_reduction <add>, %280, %cst_92 [1] : vector<16x32xf32> to vector<16xf32>
    %282 = vector.shape_cast %281 : vector<16xf32> to vector<16x1xf32>
    %cst_93 = arith.constant 3.200000e+01 : f32
    %283 = vector.broadcast %cst_93 : f32 to vector<16x1xf32>
    %284 = arith.divf %282, %283 : vector<16x1xf32>
    %285 = vector.broadcast %277 : vector<16x1xf32> to vector<16x32xf32>
    %286 = arith.subf %271, %285 : vector<16x32xf32>
    %cst_94 = arith.constant 9.99999974E-6 : f32
    %287 = vector.broadcast %cst_94 : f32 to vector<16x1xf32>
    %288 = arith.addf %284, %287 : vector<16x1xf32>
    %289 = math.rsqrt %288 : vector<16x1xf32>
    %290 = vector.broadcast %289 : vector<16x1xf32> to vector<16x32xf32>
    %291 = arith.mulf %286, %290 : vector<16x32xf32>
    %292 = vector.broadcast %272 : vector<1x32xf32> to vector<16x32xf32>
    %293 = arith.mulf %291, %292 : vector<16x32xf32>
    %294 = vector.broadcast %273 : vector<1x32xf32> to vector<16x32xf32>
    %295 = arith.addf %293, %294 : vector<16x32xf32>
    %296 = arith.truncf %295 : vector<16x32xf32> to vector<16x32xbf16>
    %c0_95 = arith.constant 0 : index
    %c0_96 = arith.constant 0 : index
    %297 = vector.load %arg10[%c0_95, %c0_96] : memref<32x128xbf16, #tpu.memory_space<vmem>>, vector<32x128xbf16>
    %cst_97 = arith.constant dense<0.000000e+00> : vector<16x128xf32>
    %298 = tpu.matmul %296, %297, %cst_97 {dimension_numbers = #tpu.dot_dimension_numbers<[1], [0], [0], [1], [0, 0, 1, 1], [], []>} : vector<16x32xbf16>, vector<32x128xbf16>, vector<16x128xf32> -> vector<16x128xf32>
    %c0_98 = arith.constant 0 : index
    %c0_99 = arith.constant 0 : index
    %299 = vector.load %arg11[%c0_98, %c0_99] : memref<1x128xf32, #tpu.memory_space<vmem>>, vector<1x128xf32>
    %300 = vector.broadcast %299 : vector<1x128xf32> to vector<16x128xf32>
    %301 = arith.addf %298, %300 : vector<16x128xf32>
    %302 = arith.negf %301 : vector<16x128xf32>
    %303 = math.exp %302 : vector<16x128xf32>
    %cst_100 = arith.constant 1.000000e+00 : f32
    %304 = vector.broadcast %cst_100 : f32 to vector<16x128xf32>
    %305 = arith.addf %304, %303 : vector<16x128xf32>
    %306 = arith.divf %304, %305 : vector<16x128xf32>
    %c0_101 = arith.constant 0 : index
    %c0_102 = arith.constant 0 : index
    %307 = vector.load %arg12[%c0_101, %c0_102] : memref<16x128xf32, #tpu.memory_space<vmem>>, vector<16x128xf32>
    tpu.vector_store %arg12[%c0_101, %c0_102], %306 {strides = array<i32>} : memref<16x128xf32, #tpu.memory_space<vmem>>, vector<16x128xf32>,
    return
  }
}

</mosaic_0001>

<bundles_post_ra>
// kernel: squeeze.4
= control target key start
LH: loop header
LB: loop body
LE: loop exit
PB: predicated region body
PF: predicated region fallthrough
CT: control target
= control target key end

     0   :  { %vm8_vm0 = vcmask 64512   ;;  %s42_s0 = inlined_call_operand.vmem [shape: f32[16], index: 0, kind: input, shape index: {}]   ;;  %s43_s1 = inlined_call_operand.vmem [shape: f32[2,8], index: 1, kind: output, shape index: {}]  }
   0x1   :  { %v5_v0 = vld [vmem:[%s42_s0] sm:$0x1]  ;;  %s25_s0 = smov 120  }
   0x2   :  { %6 = vst [vmem:[#allocation1] sm:$0x1] %v5_v0 }
   0x9   :  { %v10_v1 = vld [vmem:[#allocation1] sm:$0x1]  }
   0xa   :  { %v7_v2 = vld [vmem:[#allocation1] sm:$0x1]   ;;  %11 = vrot.lane.b32.xlu0 %v10_v1, %s25_s0 }
   0xb   :  { %9 = vst.msk [vmem:[#allocation0] sm:$0x1] %vm8_vm0, %v7_v2  }
  0x7c   :  { %v12_v3 = vpop.permute.xlu0 %11  }
  0x7d   :  { %15 = vst.msk [vmem:[#allocation0 + $0x1] sm:$0x1] %vm8_vm0, %v12_v3  }
  0x84   :  { %v20_v4 = vld [vmem:[#allocation0] sm:$0x3] }
  0x85   :  { %23 = vst [vmem:[%s43_s1] sm:$0x3] %v20_v4 }

// kernel: model_forward.1
= control target key start
LH: loop header
LB: loop body
LE: loop exit
PB: predicated region body
PF: predicated region fallthrough
CT: control target
= control target key end

     0   :  { %vm45_vm0 = vcmask 261120   ;;  %v1628_v14 = vmov 0.0   ;;  %vm1629_vm1 = vmmov 0   ;;  %v73_v23 = vlaneseq  ;;  %s1630_s13 = smov 96   ;;  %s2020_s0 = inlined_call_operand.vmem [shape: f32[16,32], index: 0, kind: input, shape index: {}]   ;;  %s2021_s3 = inlined_call_operand.vmem [shape: bf16[2,32,96], index: 3, kind: input, shape index: {}]   ;;  %s2022_s2 = inlined_call_operand.vmem [shape: f32[2,32], index: 2, kind: input, shape index: {}]   ;;  %s2023_s4 = inlined_call_operand.vmem [shape: f32[2,1,96], index: 4, kind: input, shape index: {}]   ;;  %s2024_s1 = inlined_call_operand.vmem [shape: f32[32,16], index: 1, kind: input, shape index: {}]   ;;  %s2025_s5 = inlined_call_operand.vmem [shape: bf16[2,32,32], index: 5, kind: input, shape index: {}]   ;;  %s2026_s9 = inlined_call_operand.vmem [shape: f32[2,6,32], index: 9, kind: input, shape index: {}]   ;;  %s2027_s6 = inlined_call_operand.vmem [shape: bf16[2,32,64], index: 6, kind: input, shape index: {}]   ;;  %s2028_s8 = inlined_call_operand.vmem [shape: bf16[2,64,32], index: 8, kind: input, shape index: {}]   ;;  %s2029_s7 = inlined_call_operand.vmem [shape: f32[2,1,64], index: 7, kind: input, shape index: {}]   ;;  %s2030_s10 = inlined_call_operand.vmem [shape: bf16[32,128], index: 10, kind: input, shape index: {}]   ;;  %s2031_s11 = inlined_call_operand.vmem [shape: f32[1,128], index: 11, kind: input, shape index: {}]   ;;  %s2032_s12 = inlined_call_operand.vmem [shape: f32[16,128], index: 12, kind: output, shape index: {}]  }
   0x1   :  { %v43_v0 = vld [vmem:[%s2020_s0] sm:$0xff]  ;;  %v44_v1 = vld [vmem:[%s2020_s0 + $0x8] sm:$0xff]  ;;  %1428 = vmatprep.subr.bf16.mxu0 %v1628_v14  ;;  %1432 = vmatprep.mubr.msk.bf16.mxu0 %vm1629_vm1, %v1628_v14  ;;  %v1764_v58 = vld [vmem:[%s2024_s1 + $0x10] sm:$0xff]  ;;  %vm238_vm6 = vcmask 130048   ;;  %vm577_vm7 = vcmask 523264  }
   0x2   :  { %v46_v2 = vsel %vm45_vm0, %v43_v0, 0.0  ;;  %v49_v3 = vsel %vm45_vm0, %v44_v1, 0.0  ;;  %v1538_v15 = vld [vmem:[%s2021_s3 + $0x8] sm:$0xff]   ;;  %v1539_v16 = vld [vmem:[%s2021_s3] sm:$0xff]   ;;  %v1717_v24 = vshrl.u32 %v73_v23, 7  ;;  %v90_v39 = vand.u32 127, %v73_v23 }
   0x3   :  { %47 = vadd.xlane.f32.xlu0 %v46_v2  ;;  %1429 = vmatpush3.bf16.msra.mxu0 %v1538_v15  ;;  %v42_v26 = vld [vmem:[%s2022_s2] sm:$0x3]  ;;  %v1777_v2 = vld [vmem:[%s2024_s1 + $0x8] sm:$0xff] }
   0x4   :  { %1430 = vmatprep.subr.bf16.mxu0 %v1628_v14  ;;  %v1720_v25 = vsub.s32 0, %v1717_v24  ;;  %v1727_v30 = vsub.s32 1, %v1717_v24  ;;  %vm96_vm2 = vcmp.ge.s32.totalorder %v90_v39, 16  ;;  %vm97_vm3 = vcmp.lt.s32.totalorder %v90_v39, 32  ;;  %v1316_v40 = vld [vmem:[%s2023_s4] ss:$0 sm:$0xff] }
   0x5   :  { %vm98_vm4 = vmand %vm96_vm2, %vm97_vm3  ;;  %vm92_vm5 = vcmp.lt.s32.totalorder %v90_v39, 16  ;;  %v1769_v60 = vld [vmem:[%s2024_s1] sm:$0xff] }
   0x6   :  { %v76_v29 = vrot.slane %v42_v26, %v1720_v25  ;;  %v82_v34 = vrot.slane %v42_v26, %v1727_v30  ;;  %v1741_v44 = vsel %vm98_vm4, 1.0, %v1628_v14  ;;  %v1744_v46 = vsel %vm92_vm5, 1.0, %v1628_v14 }
   0x7   :  { %50 = vadd.xlane.f32.xlu0 %v49_v3  ;;  %1431 = vmatpush3.bf16.msra.mxu0 %v1539_v16 }
  0x8c   :  { %v48_v4 = vpop.xlane.xlu0 %47 }
  0x8d   :  { %v53_v5 = vmul.f32 0.03125, %v48_v4 }
  0x8f   :  { %v55_v6 = vsub.f32 %v43_v0, %v53_v5 }
  0x90   :  { %v51_v7 = vpop.xlane.xlu0 %50 }
  0x91   :  { %v54_v8 = vmul.f32 0.03125, %v51_v7  ;;  %v57_v9 = vmul.f32 %v55_v6, %v55_v6 }
  0x93   :  { %v56_v10 = vsub.f32 %v44_v1, %v54_v8  ;;  %v59_v11 = vsel %vm45_vm0, %v57_v9, 0.0 }
  0x94   :  { %60 = vadd.xlane.f32.xlu1 %v59_v11 }
  0x95   :  { %v58_v12 = vmul.f32 %v56_v10, %v56_v10 }
  0x97   :  { %v62_v13 = vsel %vm45_vm0, %v58_v12, 0.0 }
  0x98   :  { %63 = vadd.xlane.f32.xlu1 %v62_v13 }
 0x11d   :  { %v61_v17 = vpop.xlane.xlu1 %60 }
 0x11e   :  { %v65_v18 = vmul.f32 0.03125, %v61_v17 }
 0x120   :  { %v67_v19 = vadd.f32 1e-05, %v65_v18 }
 0x121   :  { %v64_v20 = vpop.xlane.xlu1 %63 }
 0x122   :  { %1560 = vrsqrt.f32 %v67_v19  ;;  %v66_v21 = vmul.f32 0.03125, %v64_v20 }
 0x124   :  { %v68_v22 = vadd.f32 1e-05, %v66_v21 }
 0x126   :  { %1562 = vrsqrt.f32 %v68_v22 }
 0x12f   :  { %v1561_v27 = vpop.eup %1560 }
 0x130   :  { %v71_v28 = vmul.f32 %v1561_v27, %v55_v6  ;;  %v1784_v6 = vld [vmem:[%s2024_s1 + $0x18] sm:$0xff]  ;;  %s1631_s1 = smov 64  }
 0x132   :  { %v77_v33 = vmul.f32 %v76_v29, %v71_v28 }
 0x133   :  { %v1563_v31 = vpop.eup %1562 }
 0x134   :  { %v72_v32 = vmul.f32 %v1563_v31, %v56_v10  ;;  %v1730_v36 = vadd.f32 %v82_v34, %v77_v33 }
 0x136   :  { %v78_v35 = vmul.f32 %v76_v29, %v72_v32 }
 0x138   :  { %v1732_v37 = vadd.f32 %v82_v34, %v78_v35 }
 0x13a   :  { %v102_v38 = vpack.c.bf16 %v1732_v37, %v1730_v36 }
 0x13c   :  { %1433 = vmatmul.mubr.msk.bf16.vlgmr.msra.gmra.mxu0 %vm45_vm0, %v102_v38 }
 0x1fc   :  { %v163_v41 = vpop.f32.mrf.mxu0 }
 0x1fd   :  { %v164_v42 = vadd.f32 %v1316_v40, %v163_v41 }
 0x1fe   :  { %v1434_v43 = vpop.f32.mrf.mxu0 }
 0x1ff   :  { %v172_v48 = vmul.f32 %v1741_v44, %v164_v42  ;;  %v170_v52 = vmul.f32 %v1744_v46, %v164_v42 }
 0x200   :  { %v166_v45 = vpop.f32.mrf.mxu0 }
 0x201   :  { %v167_v47 = vadd.f32 %v1316_v40, %v166_v45 }
 0x202   :  { %v1435_v49 = vpop.f32.mrf.mxu0 }
 0x203   :  { %v173_v50 = vmul.f32 %v1741_v44, %v167_v47  ;;  %v1748_v51 = vpack.c.bf16 %v167_v47, %v164_v42  ;;  %v171_v53 = vmul.f32 %v1744_v46, %v167_v47 }
 0x205   :  { %v175_v54 = vpack.c.bf16 %v173_v50, %v172_v48  ;;  %178 = vrot.lane.b32.xlu0 %v1748_v51, %s1630_s13  ;;  %v174_v55 = vpack.c.bf16 %v171_v53, %v170_v52  ;;  %v1540_v53 = vld [vmem:[%s2025_s5 + $0x8] sm:$0xff]  }
 0x207   :  { %1438 = vmatprep.mubr.msk.bf16.mxu1 %vm45_vm0, %v174_v55 }
 0x277   :  { %v179_v56 = vpop.permute.xlu0 %178 }
 0x278   :  { %1532 = vmatprep.subr.msk.bf16.mxu1 %vm45_vm0, %v179_v56  ;;  %v187_v57 = vsel %vm45_vm0, %v179_v56, 0 }
 0x279   :  { %1437 = vmatpush3.bf16.xpose.msra.mxu1 %v187_v57 }
 0x27a   :  { %1448 = vmatprep.subr.bf16.mxu1 %v1628_v14 }
 0x280   :  { %1439 = vmatmul.mubr.msk.bf16.vlgmr.msra.gmra.mxu1 %vm45_vm0, %v175_v54  ;;  %v1541_v54 = vld [vmem:[%s2025_s5] sm:$0xff]  }
 0x281   :  { %1452 = vmatprep.mubr.msk.bf16.mxu1 %vm1629_vm1, %v1628_v14  ;;  %1449 = vmatpush3.bf16.msra.mxu1 %v1540_v53 }
 0x282   :  { %1450 = vmatprep.subr.bf16.mxu1 %v1628_v14 }
 0x285   :  { %1451 = vmatpush3.bf16.msra.mxu1 %v1541_v54  ;;  %v1544_v54 = vld [vmem:[%s2028_s8 + $0x18] sm:$0xff]  }
 0x286   :  { %1464 = vmatprep.subr.bf16.mxu1 %v1628_v14 }
 0x340   :  { %v1440_v59 = vpop.f32.mrf.mxu1 }
 0x341   :  { %v232_v61 = vadd.f32 %v1440_v59, %v1764_v58 }
 0x342   :  { %v223_v62 = vpop.f32.mrf.mxu1 }
 0x343   :  { %v224_v63 = vadd.f32 %v223_v62, %v1769_v60  ;;  %v245_v0 = vsel %vm238_vm6, %v232_v61, -inf }
 0x344   :  { %246 = vmax.xlane.f32.xlu1 %v245_v0  ;;  %v1441_v1 = vpop.f32.mrf.mxu1 }
 0x345   :  { %v239_v5 = vsel %vm238_vm6, %v224_v63, -inf  ;;  %v235_v7 = vadd.f32 %v1441_v1, %v1784_v6 }
 0x346   :  { %v226_v3 = vpop.f32.mrf.mxu1 }
 0x347   :  { %v227_v4 = vadd.f32 %v226_v3, %v1777_v2  ;;  %v248_v9 = vsel %vm238_vm6, %v235_v7, -inf }
 0x348   :  { %240 = vmax.xlane.f32.xlu1 %v239_v5  ;;  %v1818_v5 = vld [vmem:[%s2026_s9] sm:$0x3f] }
 0x349   :  { %v242_v8 = vsel %vm238_vm6, %v227_v4, -inf }
 0x34c   :  { %243 = vmax.xlane.f32.xlu1 %v242_v8 }
 0x350   :  { %249 = vmax.xlane.f32.xlu1 %v248_v9 }
 0x3cd   :  { %v247_v10 = vpop.xlane.xlu1 %246 }
 0x3ce   :  { %v253_v11 = vsub.f32 %v232_v61, %v247_v10 }
 0x3d0   :  { %v259_v12 = vmul.f32 1.442695, %v253_v11 }
 0x3d1   :  { %v241_v13 = vpop.xlane.xlu1 %240 }
 0x3d2   :  { %1564 = vpow2.f32 %v259_v12  ;;  %v251_v15 = vsub.f32 %v224_v63, %v241_v13 }
 0x3d4   :  { %v255_v16 = vmul.f32 1.442695, %v251_v15 }
 0x3d5   :  { %v244_v17 = vpop.xlane.xlu1 %243 }
 0x3d6   :  { %1566 = vpow2.f32 %v255_v16  ;;  %v252_v18 = vsub.f32 %v227_v4, %v244_v17 }
 0x3d8   :  { %v257_v21 = vmul.f32 1.442695, %v252_v18 }
 0x3d9   :  { %v250_v19 = vpop.xlane.xlu1 %249 }
 0x3da   :  { %v254_v20 = vsub.f32 %v235_v7, %v250_v19  ;;  %v357_v7 = vrot.slane %v1818_v5, %v1720_v25 }
 0x3dc   :  { %v261_v22 = vmul.f32 1.442695, %v254_v20 }
 0x3de   :  { %1568 = vpow2.f32 %v261_v22 }
 0x3df   :  { %v1565_v23 = vpop.eup %1564  ;;  %1570 = vpow2.f32 %v257_v21 }
 0x3e0   :  { %v269_v26 = vsel %vm238_vm6, %v1565_v23, 0.0 }
 0x3e1   :  { %270 = vadd.xlane.f32.xlu0 %v269_v26 }
 0x3e3   :  { %v1567_v27 = vpop.eup %1566 }
 0x3e4   :  { %v263_v28 = vsel %vm238_vm6, %v1567_v27, 0.0 }
 0x3e5   :  { %264 = vadd.xlane.f32.xlu1 %v263_v28 }
 0x3eb   :  { %v1569_v29 = vpop.eup %1568 }
 0x3ec   :  { %v272_v31 = vsel %vm238_vm6, %v1569_v29, 0.0  ;;  %v1571_v32 = vpop.eup %1570 }
 0x3ed   :  { %273 = vadd.xlane.f32.xlu1 %v272_v31  ;;  %v266_v33 = vsel %vm238_vm6, %v1571_v32, 0.0  ;;  %v1543_v31 = vld [vmem:[%s2027_s6] sm:$0xff]  }
 0x3f1   :  { %267 = vadd.xlane.f32.xlu1 %v266_v33 }
 0x402   :  { %285 = vrot.lane.b32.xlu1 %v1748_v51, %s1631_s1 }
 0x46a   :  { %v271_v38 = vpop.xlane.xlu0 %270 }
 0x46e   :  { %v265_v34 = vpop.xlane.xlu1 %264 }
 0x476   :  { %v274_v35 = vpop.xlane.xlu1 %273 }
 0x477   :  { %1572 = vrcp.f32 %v274_v35 }
 0x478   :  { %1574 = vrcp.f32 %v265_v34 }
 0x479   :  { %1576 = vrcp.f32 %v271_v38 }
 0x47a   :  { %v268_v39 = vpop.xlane.xlu1 %267 }
 0x47b   :  { %1578 = vrcp.f32 %v268_v39 }
 0x47e   :  { %v286_v40 = vpop.permute.xlu1 %285 }
 0x47f   :  { %1442 = vmatprep.subr.bf16.mxu0 %v286_v40 }
 0x480   :  { %1443 = vmatpush3.bf16.msra.mxu0 %v286_v40 }
 0x481   :  { %1456 = vmatprep.subr.bf16.mxu0 %v1628_v14 }
 0x484   :  { %v1573_v41 = vpop.eup %1572 }
 0x485   :  { %v1575_v42 = vpop.eup %1574  ;;  %v282_v47 = vmul.f32 %v1573_v41, %v1569_v29 }
 0x486   :  { %v1577_v43 = vpop.eup %1576  ;;  %v279_v48 = vmul.f32 %v1575_v42, %v1567_v27  ;;  %v445_v42 = vrot.slane %v1818_v5, %v1727_v30 }
 0x487   :  { %v281_v50 = vmul.f32 %v1577_v43, %v1565_v23  ;;  %v450_v43 = vsub.s32 2, %v1717_v24 }
 0x488   :  { %v1579_v45 = vpop.eup %1578 }
 0x489   :  { %v280_v49 = vmul.f32 %v1579_v45, %v1571_v32  ;;  %v284_v52 = vpack.c.bf16 %v282_v47, %v281_v50 }
 0x48b   :  { %v283_v51 = vpack.c.bf16 %v280_v49, %v279_v48  ;;  %v451_v49 = vrot.slane %v1818_v5, %v450_v43 }
 0x48d   :  { %1444 = vmatprep.mubr.msk.bf16.mxu0 %vm238_vm6, %v283_v51 }
 0x48e   :  { %1445 = vmatmul.mubr.msk.bf16.vlgmr.msra.gmra.mxu0 %vm238_vm6, %v284_v52 }
 0x48f   :  { %1460 = vmatprep.mubr.msk.bf16.mxu0 %vm1629_vm1, %v1628_v14 }
 0x54e   :  { %v1446_v55 = vpop.f32.mrf.mxu0 }
 0x54f   :  { %v345_v62 = vmul.f32 %v1446_v55, %v1741_v44  ;;  %v1545_v55 = vld [vmem:[%s2028_s8 + $0x10] sm:$0xff]  }
 0x550   :  { %v328_v56 = vpop.f32.mrf.mxu0 }
 0x551   :  { %v343_v59 = vmul.f32 %v1744_v46, %v328_v56  ;;  %v1546_v56 = vld [vmem:[%s2028_s8 + $0x8] sm:$0xff]  }
 0x552   :  { %v1447_v57 = vpop.f32.mrf.mxu0 }
 0x553   :  { %v346_v63 = vmul.f32 %v1447_v57, %v1741_v44  ;;  %v347_v1 = vadd.f32 %v345_v62, %v343_v59  ;;  %v1547_v57 = vld [vmem:[%s2028_s8] sm:$0xff]  }
 0x554   :  { %v331_v61 = vpop.f32.mrf.mxu0  ;;  %v1327_v59 = vld [vmem:[%s2029_s7] ss:$0 sm:$0xff] }
 0x555   :  { %v344_v0 = vmul.f32 %v1744_v46, %v331_v61 }
 0x557   :  { %v348_v3 = vadd.f32 %v346_v63, %v344_v0 }
 0x559   :  { %v349_v4 = vpack.c.bf16 %v348_v3, %v347_v1 }
 0x55b   :  { %1453 = vmatmul.mubr.msk.bf16.vlgmr.msra.gmra.mxu1 %vm45_vm0, %v349_v4 }
 0x55c   :  { %1472 = vmatprep.mubr.msk.bf16.mxu1 %vm1629_vm1, %v1628_v14  ;;  %1465 = vmatpush3.bf16.msra.mxu1 %v1544_v54 }
 0x55d   :  { %1466 = vmatprep.subr.bf16.mxu1 %v1628_v14 }
 0x560   :  { %1467 = vmatpush3.bf16.msra.mxu1 %v1545_v55  ;;  %v1549_v55 = vld [vmem:[%s2021_s3 + $0x10] sm:$0xff]  }
 0x561   :  { %1468 = vmatprep.subr.bf16.mxu1 %v1628_v14 }
 0x564   :  { %1469 = vmatpush3.bf16.msra.mxu1 %v1546_v56 }
 0x565   :  { %1470 = vmatprep.subr.bf16.mxu1 %v1628_v14 }
 0x568   :  { %1471 = vmatpush3.bf16.msra.mxu1 %v1547_v57 }
 0x61b   :  { %v407_v8 = vpop.f32.mrf.mxu1 }
 0x61c   :  { %v408_v9 = vadd.f32 %v407_v8, %v357_v7 }
 0x61d   :  { %v1454_v10 = vpop.f32.mrf.mxu1 }
 0x61e   :  { %v414_v11 = vadd.f32 %v408_v9, %v1730_v36 }
 0x61f   :  { %v410_v12 = vpop.f32.mrf.mxu1 }
 0x620   :  { %v411_v13 = vadd.f32 %v410_v12, %v357_v7  ;;  %v416_v15 = vsel %vm45_vm0, %v414_v11, 0.0 }
 0x621   :  { %417 = vadd.xlane.f32.xlu1 %v416_v15  ;;  %v1455_v16 = vpop.f32.mrf.mxu1 }
 0x622   :  { %v415_v17 = vadd.f32 %v411_v13, %v1732_v37  ;;  %v1542_v37 = vld [vmem:[%s2027_s6 + $0x8] sm:$0xff]  }
 0x623   :  { %1457 = vmatpush3.bf16.msra.mxu0 %v1542_v37 }
 0x624   :  { %v419_v18 = vsel %vm45_vm0, %v415_v17, 0.0  ;;  %1458 = vmatprep.subr.bf16.mxu0 %v1628_v14 }
 0x625   :  { %420 = vadd.xlane.f32.xlu0 %v419_v18 }
 0x627   :  { %1459 = vmatpush3.bf16.msra.mxu0 %v1543_v31 }
 0x628   :  { %1476 = vmatprep.subr.bf16.mxu0 %v1628_v14 }
 0x6aa   :  { %v418_v19 = vpop.xlane.xlu1 %417 }
 0x6ab   :  { %v422_v20 = vmul.f32 0.03125, %v418_v19 }
 0x6ad   :  { %v424_v21 = vsub.f32 %v414_v11, %v422_v20 }
 0x6ae   :  { %v421_v22 = vpop.xlane.xlu0 %420 }
 0x6af   :  { %v423_v23 = vmul.f32 0.03125, %v421_v22  ;;  %v426_v26 = vmul.f32 %v424_v21, %v424_v21 }
 0x6b1   :  { %v425_v27 = vsub.f32 %v415_v17, %v423_v23  ;;  %v428_v36 = vsel %vm45_vm0, %v426_v26, 0.0 }
 0x6b2   :  { %429 = vadd.xlane.f32.xlu0 %v428_v36  ;;  %v551_v36 = vsub.s32 3, %v1717_v24 }
 0x6b3   :  { %v427_v28 = vmul.f32 %v425_v27, %v425_v27 }
 0x6b5   :  { %v431_v29 = vsel %vm45_vm0, %v427_v28, 0.0  ;;  %v552_v28 = vrot.slane %v1818_v5, %v551_v36 }
 0x6b6   :  { %432 = vadd.xlane.f32.xlu0 %v431_v29 }
 0x73b   :  { %v430_v32 = vpop.xlane.xlu0 %429 }
 0x73c   :  { %v434_v33 = vmul.f32 0.03125, %v430_v32 }
 0x73e   :  { %v436_v34 = vadd.f32 1e-05, %v434_v33 }
 0x73f   :  { %v433_v35 = vpop.xlane.xlu0 %432 }
 0x740   :  { %1580 = vrsqrt.f32 %v436_v34  ;;  %v435_v38 = vmul.f32 0.03125, %v433_v35 }
 0x742   :  { %v437_v39 = vadd.f32 1e-05, %v435_v38 }
 0x744   :  { %1582 = vrsqrt.f32 %v437_v39 }
 0x74d   :  { %v1581_v40 = vpop.eup %1580 }
 0x74e   :  { %v440_v41 = vmul.f32 %v1581_v40, %v424_v21 }
 0x750   :  { %v446_v48 = vmul.f32 %v445_v42, %v440_v41 }
 0x751   :  { %v1583_v45 = vpop.eup %1582 }
 0x752   :  { %v441_v47 = vmul.f32 %v1583_v45, %v425_v27  ;;  %v452_v51 = vadd.f32 %v451_v49, %v446_v48 }
 0x754   :  { %v447_v50 = vmul.f32 %v445_v42, %v441_v47 }
 0x756   :  { %v453_v52 = vadd.f32 %v451_v49, %v447_v50 }
 0x758   :  { %v454_v53 = vpack.c.bf16 %v453_v52, %v452_v51 }
 0x75a   :  { %1461 = vmatmul.mubr.msk.bf16.vlgmr.msra.gmra.mxu0 %vm45_vm0, %v454_v53 }
 0x75b   :  { %1480 = vmatprep.mubr.msk.bf16.mxu0 %vm1629_vm1, %v1628_v14 }
 0x81a   :  { %v515_v61 = vpop.f32.mrf.mxu0 }
 0x81b   :  { %v516_v62 = vadd.f32 %v1327_v59, %v515_v61 }
 0x81c   :  { %v1462_v63 = vpop.f32.mrf.mxu0 }
 0x81d   :  { %v522_v0 = vmul.f32 %v516_v62, %v516_v62 }
 0x81e   :  { %v518_v1 = vpop.f32.mrf.mxu0 }
 0x81f   :  { %v524_v3 = vmul.f32 %v522_v0, %v516_v62  ;;  %v519_v4 = vadd.f32 %v1327_v59, %v518_v1  ;;  %v652_v0 = vsub.s32 4, %v1717_v24 }
 0x820   :  { %v1463_v7 = vpop.f32.mrf.mxu0 }
 0x821   :  { %v526_v8 = vmul.f32 0.044715, %v524_v3  ;;  %v523_v9 = vmul.f32 %v519_v4, %v519_v4  ;;  %v658_v7 = vsub.s32 5, %v1717_v24 }
 0x823   :  { %v528_v10 = vadd.f32 %v526_v8, %v516_v62  ;;  %v525_v11 = vmul.f32 %v523_v9, %v519_v4 }
 0x825   :  { %v530_v12 = vmul.f32 0.7978846, %v528_v10  ;;  %v527_v13 = vmul.f32 0.044715, %v525_v11  ;;  %v659_v11 = vrot.slane %v1818_v5, %v658_v7 }
 0x827   :  { %1584 = vtanh.f32 %v530_v12  ;;  %v529_v15 = vadd.f32 %v527_v13, %v519_v4 }
 0x829   :  { %v531_v16 = vmul.f32 0.7978846, %v529_v15 }
 0x82b   :  { %1586 = vtanh.f32 %v531_v16 }
 0x834   :  { %v1585_v17 = vpop.eup %1584 }
 0x835   :  { %v534_v18 = vadd.f32 1.0, %v1585_v17  ;;  %v1342_v17 = vld [vmem:[%s2023_s4 + $0x1] ss:$0 sm:$0xff] }
 0x837   :  { %v536_v20 = vmul.f32 0.5, %v534_v18 }
 0x838   :  { %v1587_v19 = vpop.eup %1586 }
 0x839   :  { %v535_v21 = vadd.f32 1.0, %v1587_v19  ;;  %v538_v23 = vmul.f32 %v536_v20, %v516_v62 }
 0x83b   :  { %v537_v22 = vmul.f32 0.5, %v535_v21 }
 0x83d   :  { %v539_v26 = vmul.f32 %v537_v22, %v519_v4  ;;  %v653_v4 = vrot.slane %v1818_v5, %v652_v0 }
 0x83f   :  { %v540_v27 = vpack.c.bf16 %v539_v26, %v538_v23 }
 0x841   :  { %1473 = vmatmul.mubr.msk.bf16.vlgmr.msra.gmra.mxu1 %vm577_vm7, %v540_v27 }
 0x901   :  { %v615_v29 = vpop.f32.mrf.mxu1 }
 0x902   :  { %v616_v37 = vadd.f32 %v615_v29, %v552_v28 }
 0x903   :  { %v1474_v31 = vpop.f32.mrf.mxu1 }
 0x904   :  { %v622_v32 = vadd.f32 %v616_v37, %v452_v51 }
 0x905   :  { %v618_v33 = vpop.f32.mrf.mxu1 }
 0x906   :  { %v619_v34 = vadd.f32 %v618_v33, %v552_v28  ;;  %v624_v35 = vsel %vm45_vm0, %v622_v32, 0.0 }
 0x907   :  { %625 = vadd.xlane.f32.xlu0 %v624_v35  ;;  %v1475_v38 = vpop.f32.mrf.mxu1 }
 0x908   :  { %v623_v39 = vadd.f32 %v619_v34, %v453_v52  ;;  %v1548_v52 = vld [vmem:[%s2021_s3 + $0x18] sm:$0xff]  }
 0x909   :  { %1477 = vmatpush3.bf16.msra.mxu0 %v1548_v52 }
 0x90a   :  { %v627_v40 = vsel %vm45_vm0, %v623_v39, 0.0  ;;  %1478 = vmatprep.subr.bf16.mxu0 %v1628_v14 }
 0x90b   :  { %628 = vadd.xlane.f32.xlu0 %v627_v40 }
 0x90d   :  { %1479 = vmatpush3.bf16.msra.mxu0 %v1549_v55 }
 0x990   :  { %v626_v41 = vpop.xlane.xlu0 %625 }
 0x991   :  { %v630_v42 = vmul.f32 0.03125, %v626_v41 }
 0x993   :  { %v632_v45 = vsub.f32 %v622_v32, %v630_v42 }
 0x994   :  { %v629_v47 = vpop.xlane.xlu0 %628 }
 0x995   :  { %v631_v48 = vmul.f32 0.03125, %v629_v47  ;;  %v634_v49 = vmul.f32 %v632_v45, %v632_v45 }
 0x997   :  { %v633_v50 = vsub.f32 %v623_v39, %v631_v48  ;;  %v636_v53 = vsel %vm45_vm0, %v634_v49, 0.0 }
 0x998   :  { %637 = vadd.xlane.f32.xlu0 %v636_v53 }
 0x999   :  { %v635_v51 = vmul.f32 %v633_v50, %v633_v50 }
 0x99b   :  { %v639_v54 = vsel %vm45_vm0, %v635_v51, 0.0 }
 0x99c   :  { %640 = vadd.xlane.f32.xlu0 %v639_v54 }
 0xa21   :  { %v638_v56 = vpop.xlane.xlu0 %637 }
 0xa22   :  { %v642_v57 = vmul.f32 0.03125, %v638_v56 }
 0xa24   :  { %v644_v59 = vadd.f32 1e-05, %v642_v57 }
 0xa25   :  { %v641_v61 = vpop.xlane.xlu0 %640 }
 0xa26   :  { %1588 = vrsqrt.f32 %v644_v59  ;;  %v643_v62 = vmul.f32 0.03125, %v641_v61 }
 0xa28   :  { %v645_v63 = vadd.f32 1e-05, %v643_v62 }
 0xa2a   :  { %1590 = vrsqrt.f32 %v645_v63 }
 0xa33   :  { %v1589_v1 = vpop.eup %1588 }
 0xa34   :  { %v648_v3 = vmul.f32 %v1589_v1, %v632_v45 }
 0xa36   :  { %v654_v10 = vmul.f32 %v653_v4, %v648_v3 }
 0xa37   :  { %v1591_v8 = vpop.eup %1590 }
 0xa38   :  { %v649_v9 = vmul.f32 %v1591_v8, %v633_v50  ;;  %v1887_v13 = vadd.f32 %v659_v11, %v654_v10 }
 0xa3a   :  { %v655_v12 = vmul.f32 %v653_v4, %v649_v9 }
 0xa3c   :  { %v1889_v15 = vadd.f32 %v659_v11, %v655_v12 }
 0xa3e   :  { %v664_v16 = vpack.c.bf16 %v1889_v15, %v1887_v13 }
 0xa40   :  { %1481 = vmatmul.mubr.msk.bf16.vlgmr.msra.gmra.mxu0 %vm45_vm0, %v664_v16 }
 0xb00   :  { %v727_v18 = vpop.f32.mrf.mxu0 }
 0xb01   :  { %v728_v19 = vadd.f32 %v1342_v17, %v727_v18 }
 0xb02   :  { %v1482_v20 = vpop.f32.mrf.mxu0 }
 0xb03   :  { %v734_v5 = vmul.f32 %v1744_v46, %v728_v19  ;;  %v736_v26 = vmul.f32 %v1741_v44, %v728_v19 }
 0xb04   :  { %v730_v21 = vpop.f32.mrf.mxu0 }
 0xb05   :  { %v731_v22 = vadd.f32 %v1342_v17, %v730_v21 }
 0xb06   :  { %v1483_v23 = vpop.f32.mrf.mxu0 }
 0xb07   :  { %v735_v27 = vmul.f32 %v1744_v46, %v731_v22  ;;  %v737_v28 = vmul.f32 %v1741_v44, %v731_v22  ;;  %v740_v29 = vpack.c.bf16 %v731_v22, %v728_v19 }
 0xb09   :  { %v738_v37 = vpack.c.bf16 %v735_v27, %v734_v5  ;;  %v739_v31 = vpack.c.bf16 %v737_v28, %v736_v26  ;;  %742 = vrot.lane.b32.xlu0 %v740_v29, %s1630_s13 }
 0xb0b   :  { %1486 = vmatprep.mubr.msk.bf16.mxu0 %vm45_vm0, %v738_v37  ;;  %v1551_v37 = vld [vmem:[%s2025_s5 + $0x10] sm:$0xff]  }
 0xb7b   :  { %v743_v32 = vpop.permute.xlu0 %742 }
 0xb7c   :  { %v751_v33 = vsel %vm45_vm0, %v743_v32, 0  ;;  %1533 = vmatprep.subr.msk.bf16.mxu0 %vm45_vm0, %v743_v32 }
 0xb7d   :  { %1485 = vmatpush3.bf16.xpose.msra.mxu0 %v751_v33 }
 0xb7e   :  { %1496 = vmatprep.subr.bf16.mxu0 %v1628_v14 }
 0xb84   :  { %1487 = vmatmul.mubr.msk.bf16.vlgmr.msra.gmra.mxu0 %vm45_vm0, %v739_v31 }
 0xb85   :  { %1500 = vmatprep.mubr.msk.bf16.mxu0 %vm1629_vm1, %v1628_v14 }
 0xc44   :  { %v1488_v34 = vpop.f32.mrf.mxu0 }
 0xc45   :  { %v796_v35 = vadd.f32 %v1488_v34, %v1764_v58 }
 0xc46   :  { %v787_v38 = vpop.f32.mrf.mxu0 }
 0xc47   :  { %v788_v39 = vadd.f32 %v787_v38, %v1769_v60  ;;  %v808_v40 = vsel %vm238_vm6, %v796_v35, -inf }
 0xc48   :  { %809 = vmax.xlane.f32.xlu1 %v808_v40  ;;  %v1489_v41 = vpop.f32.mrf.mxu0 }
 0xc49   :  { %v802_v47 = vsel %vm238_vm6, %v788_v39, -inf  ;;  %v799_v48 = vadd.f32 %v1489_v41, %v1784_v6 }
 0xc4a   :  { %v790_v42 = vpop.f32.mrf.mxu0 }
 0xc4b   :  { %v791_v45 = vadd.f32 %v790_v42, %v1777_v2  ;;  %v811_v58 = vsel %vm238_vm6, %v799_v48, -inf }
 0xc4c   :  { %803 = vmax.xlane.f32.xlu1 %v802_v47  ;;  %v1945_v47 = vld [vmem:[%s2026_s9 + $0x8] sm:$0x3f] }
 0xc4d   :  { %v805_v49 = vsel %vm238_vm6, %v791_v45, -inf }
 0xc50   :  { %806 = vmax.xlane.f32.xlu1 %v805_v49 }
 0xc54   :  { %812 = vmax.xlane.f32.xlu1 %v811_v58 }
 0xcd1   :  { %v810_v50 = vpop.xlane.xlu1 %809 }
 0xcd2   :  { %v816_v60 = vsub.f32 %v796_v35, %v810_v50 }
 0xcd4   :  { %v822_v53 = vmul.f32 1.442695, %v816_v60 }
 0xcd5   :  { %v804_v51 = vpop.xlane.xlu1 %803 }
 0xcd6   :  { %1592 = vpow2.f32 %v822_v53  ;;  %v814_v54 = vsub.f32 %v788_v39, %v804_v51 }
 0xcd8   :  { %v818_v52 = vmul.f32 1.442695, %v814_v54 }
 0xcd9   :  { %v807_v55 = vpop.xlane.xlu1 %806 }
 0xcda   :  { %1594 = vpow2.f32 %v818_v52  ;;  %v815_v2 = vsub.f32 %v791_v45, %v807_v55 }
 0xcdc   :  { %v820_v59 = vmul.f32 1.442695, %v815_v2 }
 0xcdd   :  { %v813_v56 = vpop.xlane.xlu1 %812 }
 0xcde   :  { %v817_v57 = vsub.f32 %v799_v48, %v813_v56  ;;  %v921_v48 = vrot.slane %v1945_v47, %v1720_v25 }
 0xce0   :  { %v824_v6 = vmul.f32 1.442695, %v817_v57 }
 0xce2   :  { %1596 = vpow2.f32 %v824_v6 }
 0xce3   :  { %v1593_v61 = vpop.eup %1592  ;;  %1598 = vpow2.f32 %v820_v59 }
 0xce4   :  { %v832_v62 = vsel %vm238_vm6, %v1593_v61, 0.0 }
 0xce5   :  { %833 = vadd.xlane.f32.xlu0 %v832_v62 }
 0xce7   :  { %v1595_v63 = vpop.eup %1594 }
 0xce8   :  { %v826_v1 = vsel %vm238_vm6, %v1595_v63, 0.0 }
 0xce9   :  { %827 = vadd.xlane.f32.xlu1 %v826_v1 }
 0xcef   :  { %v1597_v3 = vpop.eup %1596 }
 0xcf0   :  { %v835_v4 = vsel %vm238_vm6, %v1597_v3, 0.0  ;;  %v1599_v8 = vpop.eup %1598 }
 0xcf1   :  { %836 = vadd.xlane.f32.xlu1 %v835_v4  ;;  %v829_v9 = vsel %vm238_vm6, %v1599_v8, 0.0 }
 0xcf5   :  { %830 = vadd.xlane.f32.xlu1 %v829_v9 }
 0xd06   :  { %848 = vrot.lane.b32.xlu1 %v740_v29, %s1631_s1  ;;  %v1550_v29 = vld [vmem:[%s2025_s5 + $0x18] sm:$0xff]  }
 0xd07   :  { %1497 = vmatpush3.bf16.msra.mxu0 %v1550_v29 }
 0xd08   :  { %1498 = vmatprep.subr.bf16.mxu0 %v1628_v14 }
 0xd0b   :  { %1499 = vmatpush3.bf16.msra.mxu0 %v1551_v37 }
 0xd0c   :  { %1512 = vmatprep.subr.bf16.mxu0 %v1628_v14 }
 0xd6e   :  { %v834_v12 = vpop.xlane.xlu0 %833 }
 0xd72   :  { %v828_v10 = vpop.xlane.xlu1 %827 }
 0xd7a   :  { %v837_v11 = vpop.xlane.xlu1 %836 }
 0xd7b   :  { %1600 = vrcp.f32 %v837_v11 }
 0xd7c   :  { %1602 = vrcp.f32 %v828_v10 }
 0xd7d   :  { %1604 = vrcp.f32 %v834_v12 }
 0xd7e   :  { %v831_v16 = vpop.xlane.xlu1 %830 }
 0xd7f   :  { %1606 = vrcp.f32 %v831_v16  ;;  %v1009_v16 = vrot.slane %v1945_v47, %v1727_v30  ;;  %v1554_v30 = vld [vmem:[%s2028_s8 + $0x38] sm:$0xff]  }
 0xd82   :  { %v849_v17 = vpop.permute.xlu1 %848 }
 0xd83   :  { %1490 = vmatprep.subr.bf16.mxu1 %v849_v17 }
 0xd84   :  { %1491 = vmatpush3.bf16.msra.mxu1 %v849_v17 }
 0xd85   :  { %1504 = vmatprep.subr.bf16.mxu1 %v1628_v14 }
 0xd88   :  { %v1601_v18 = vpop.eup %1600 }
 0xd89   :  { %v1603_v19 = vpop.eup %1602  ;;  %v845_v22 = vmul.f32 %v1601_v18, %v1597_v3 }
 0xd8a   :  { %v1605_v20 = vpop.eup %1604  ;;  %v842_v5 = vmul.f32 %v1603_v19, %v1595_v63  ;;  %v1553_v63 = vld [vmem:[%s2027_s6 + $0x10] sm:$0xff]  }
 0xd8b   :  { %v844_v26 = vmul.f32 %v1605_v20, %v1593_v61  ;;  %v1015_v20 = vrot.slane %v1945_v47, %v450_v43  ;;  %v1555_v43 = vld [vmem:[%s2028_s8 + $0x30] sm:$0xff]  }
 0xd8c   :  { %v1607_v21 = vpop.eup %1606 }
 0xd8d   :  { %v843_v23 = vmul.f32 %v1607_v21, %v1599_v8  ;;  %v847_v28 = vpack.c.bf16 %v845_v22, %v844_v26  ;;  %v1556_v26 = vld [vmem:[%s2028_s8 + $0x28] sm:$0xff]  }
 0xd8f   :  { %v846_v27 = vpack.c.bf16 %v843_v23, %v842_v5 }
 0xd91   :  { %1492 = vmatprep.mubr.msk.bf16.mxu1 %vm238_vm6, %v846_v27  ;;  %v1557_v27 = vld [vmem:[%s2028_s8 + $0x20] sm:$0xff]  }
 0xd92   :  { %1493 = vmatmul.mubr.msk.bf16.vlgmr.msra.gmra.mxu1 %vm238_vm6, %v847_v28  ;;  %v1362_v28 = vld [vmem:[%s2029_s7 + $0x1] ss:$0 sm:$0xff] }
 0xd93   :  { %1508 = vmatprep.mubr.msk.bf16.mxu1 %vm1629_vm1, %v1628_v14 }
 0xe52   :  { %v1494_v31 = vpop.f32.mrf.mxu1 }
 0xe53   :  { %v908_v38 = vmul.f32 %v1494_v31, %v1741_v44 }
 0xe54   :  { %v891_v32 = vpop.f32.mrf.mxu1 }
 0xe55   :  { %v906_v34 = vmul.f32 %v1744_v46, %v891_v32 }
 0xe56   :  { %v1495_v33 = vpop.f32.mrf.mxu1 }
 0xe57   :  { %v909_v39 = vmul.f32 %v1495_v33, %v1741_v44  ;;  %v910_v41 = vadd.f32 %v908_v38, %v906_v34 }
 0xe58   :  { %v894_v35 = vpop.f32.mrf.mxu1 }
 0xe59   :  { %v907_v40 = vmul.f32 %v1744_v46, %v894_v35 }
 0xe5b   :  { %v911_v42 = vadd.f32 %v909_v39, %v907_v40 }
 0xe5d   :  { %v912_v45 = vpack.c.bf16 %v911_v42, %v910_v41 }
 0xe5f   :  { %1501 = vmatmul.mubr.msk.bf16.vlgmr.msra.gmra.mxu0 %vm45_vm0, %v912_v45 }
 0xe60   :  { %1520 = vmatprep.mubr.msk.bf16.mxu0 %vm1629_vm1, %v1628_v14  ;;  %1513 = vmatpush3.bf16.msra.mxu0 %v1554_v30 }
 0xe61   :  { %1514 = vmatprep.subr.bf16.mxu0 %v1628_v14 }
 0xe64   :  { %1515 = vmatpush3.bf16.msra.mxu0 %v1555_v43 }
 0xe65   :  { %1516 = vmatprep.subr.bf16.mxu0 %v1628_v14 }
 0xe68   :  { %1517 = vmatpush3.bf16.msra.mxu0 %v1556_v26  ;;  %v1219_v26 = vrot.slane %v1945_v47, %v652_v0 }
 0xe69   :  { %1518 = vmatprep.subr.bf16.mxu0 %v1628_v14 }
 0xe6c   :  { %1519 = vmatpush3.bf16.msra.mxu0 %v1557_v27 }
 0xf1f   :  { %v971_v49 = vpop.f32.mrf.mxu0 }
 0xf20   :  { %v972_v44 = vadd.f32 %v971_v49, %v921_v48 }
 0xf21   :  { %v1502_v58 = vpop.f32.mrf.mxu0 }
 0xf22   :  { %v978_v46 = vadd.f32 %v972_v44, %v1887_v13 }
 0xf23   :  { %v974_v50 = vpop.f32.mrf.mxu0 }
 0xf24   :  { %v975_v60 = vadd.f32 %v974_v50, %v921_v48  ;;  %v980_v53 = vsel %vm45_vm0, %v978_v46, 0.0 }
 0xf25   :  { %981 = vadd.xlane.f32.xlu1 %v980_v53  ;;  %v1503_v51 = vpop.f32.mrf.mxu0 }
 0xf26   :  { %v979_v54 = vadd.f32 %v975_v60, %v1889_v15  ;;  %v1552_v15 = vld [vmem:[%s2027_s6 + $0x18] sm:$0xff]  }
 0xf27   :  { %1505 = vmatpush3.bf16.msra.mxu1 %v1552_v15 }
 0xf28   :  { %v983_v52 = vsel %vm45_vm0, %v979_v54, 0.0  ;;  %1506 = vmatprep.subr.bf16.mxu1 %v1628_v14 }
 0xf29   :  { %984 = vadd.xlane.f32.xlu0 %v983_v52 }
 0xf2b   :  { %1507 = vmatpush3.bf16.msra.mxu1 %v1553_v63 }
 0xf2c   :  { %1524 = vmatprep.subr.bf16.mxu1 %v1628_v14 }
 0xfae   :  { %v982_v55 = vpop.xlane.xlu1 %981 }
 0xfaf   :  { %v986_v2 = vmul.f32 0.03125, %v982_v55 }
 0xfb1   :  { %v988_v56 = vsub.f32 %v978_v46, %v986_v2  ;;  %v1119_v2 = vrot.slane %v1945_v47, %v551_v36 }
 0xfb2   :  { %v985_v25 = vpop.xlane.xlu0 %984 }
 0xfb3   :  { %v987_v57 = vmul.f32 0.03125, %v985_v25  ;;  %v990_v59 = vmul.f32 %v988_v56, %v988_v56 }
 0xfb5   :  { %v989_v6 = vsub.f32 %v979_v54, %v987_v57  ;;  %v992_v13 = vsel %vm45_vm0, %v990_v59, 0.0 }
 0xfb6   :  { %993 = vadd.xlane.f32.xlu0 %v992_v13 }
 0xfb7   :  { %v991_v61 = vmul.f32 %v989_v6, %v989_v6 }
 0xfb9   :  { %v995_v62 = vsel %vm45_vm0, %v991_v61, 0.0 }
 0xfba   :  { %996 = vadd.xlane.f32.xlu0 %v995_v62 }
0x103f   :  { %v994_v1 = vpop.xlane.xlu0 %993 }
0x1040   :  { %v998_v3 = vmul.f32 0.03125, %v994_v1 }
0x1042   :  { %v1000_v4 = vadd.f32 1e-05, %v998_v3 }
0x1043   :  { %v997_v8 = vpop.xlane.xlu0 %996 }
0x1044   :  { %1608 = vrsqrt.f32 %v1000_v4  ;;  %v999_v9 = vmul.f32 0.03125, %v997_v8 }
0x1046   :  { %v1001_v10 = vadd.f32 1e-05, %v999_v9 }
0x1048   :  { %1610 = vrsqrt.f32 %v1001_v10 }
0x1051   :  { %v1609_v11 = vpop.eup %1608 }
0x1052   :  { %v1004_v12 = vmul.f32 %v1609_v11, %v988_v56 }
0x1054   :  { %v1010_v19 = vmul.f32 %v1009_v16, %v1004_v12 }
0x1055   :  { %v1611_v17 = vpop.eup %1610 }
0x1056   :  { %v1005_v18 = vmul.f32 %v1611_v17, %v989_v6  ;;  %v1016_v22 = vadd.f32 %v1015_v20, %v1010_v19  ;;  %v1558_v17 = vld [vmem:[%s2030_s10 + $0x8] sm:$0xff]  }
0x1058   :  { %v1011_v21 = vmul.f32 %v1009_v16, %v1005_v18  ;;  %v1559_v18 = vld [vmem:[%s2030_s10] sm:$0xff]  }
0x105a   :  { %v1017_v5 = vadd.f32 %v1015_v20, %v1011_v21 }
0x105c   :  { %v1018_v23 = vpack.c.bf16 %v1017_v5, %v1016_v22 }
0x105e   :  { %1509 = vmatmul.mubr.msk.bf16.vlgmr.msra.gmra.mxu1 %vm45_vm0, %v1018_v23 }
0x105f   :  { %1528 = vmatprep.mubr.msk.bf16.mxu1 %vm1629_vm1, %v1628_v14  ;;  %1525 = vmatpush3.bf16.msra.mxu1 %v1558_v17 }
0x1060   :  { %1526 = vmatprep.subr.bf16.mxu1 %v1628_v14  ;;  %v1225_v14 = vrot.slane %v1945_v47, %v658_v7 }
0x1063   :  { %1527 = vmatpush3.bf16.msra.mxu1 %v1559_v18 }
0x111e   :  { %v1081_v29 = vpop.f32.mrf.mxu1 }
0x111f   :  { %v1082_v37 = vadd.f32 %v1362_v28, %v1081_v29 }
0x1120   :  { %v1510_v31 = vpop.f32.mrf.mxu1 }
0x1121   :  { %v1088_v32 = vmul.f32 %v1082_v37, %v1082_v37 }
0x1122   :  { %v1084_v33 = vpop.f32.mrf.mxu1 }
0x1123   :  { %v1090_v34 = vmul.f32 %v1088_v32, %v1082_v37  ;;  %v1085_v35 = vadd.f32 %v1362_v28, %v1084_v33 }
0x1124   :  { %v1511_v38 = vpop.f32.mrf.mxu1 }
0x1125   :  { %v1092_v39 = vmul.f32 0.044715, %v1090_v34  ;;  %v1089_v40 = vmul.f32 %v1085_v35, %v1085_v35  ;;  %v1379_v34 = vld [vmem:[%s2031_s11] ss:$0 sm:$0xff] }
0x1127   :  { %v1094_v41 = vadd.f32 %v1092_v39, %v1082_v37  ;;  %v1091_v42 = vmul.f32 %v1089_v40, %v1085_v35 }
0x1129   :  { %v1096_v45 = vmul.f32 0.7978846, %v1094_v41  ;;  %v1093_v48 = vmul.f32 0.044715, %v1091_v42 }
0x112b   :  { %1612 = vtanh.f32 %v1096_v45  ;;  %v1095_v49 = vadd.f32 %v1093_v48, %v1085_v35 }
0x112d   :  { %v1097_v44 = vmul.f32 0.7978846, %v1095_v49 }
0x112f   :  { %1614 = vtanh.f32 %v1097_v44 }
0x1138   :  { %v1613_v58 = vpop.eup %1612 }
0x1139   :  { %v1100_v46 = vadd.f32 1.0, %v1613_v58 }
0x113b   :  { %v1102_v60 = vmul.f32 0.5, %v1100_v46 }
0x113c   :  { %v1615_v50 = vpop.eup %1614 }
0x113d   :  { %v1101_v53 = vadd.f32 1.0, %v1615_v50  ;;  %v1104_v54 = vmul.f32 %v1102_v60, %v1082_v37 }
0x113f   :  { %v1103_v51 = vmul.f32 0.5, %v1101_v53 }
0x1141   :  { %v1105_v52 = vmul.f32 %v1103_v51, %v1085_v35 }
0x1143   :  { %v1106_v55 = vpack.c.bf16 %v1105_v52, %v1104_v54 }
0x1145   :  { %1521 = vmatmul.mubr.msk.bf16.vlgmr.msra.gmra.mxu0 %vm577_vm7, %v1106_v55 }
0x1205   :  { %v1181_v56 = vpop.f32.mrf.mxu0 }
0x1206   :  { %v1182_v25 = vadd.f32 %v1181_v56, %v1119_v2 }
0x1207   :  { %v1522_v57 = vpop.f32.mrf.mxu0 }
0x1208   :  { %v1188_v59 = vadd.f32 %v1182_v25, %v1016_v22 }
0x1209   :  { %v1184_v6 = vpop.f32.mrf.mxu0 }
0x120a   :  { %v1185_v13 = vadd.f32 %v1184_v6, %v1119_v2  ;;  %v1190_v61 = vsel %vm45_vm0, %v1188_v59, 0.0 }
0x120b   :  { %1191 = vadd.xlane.f32.xlu0 %v1190_v61  ;;  %v1523_v62 = vpop.f32.mrf.mxu0 }
0x120c   :  { %v1189_v15 = vadd.f32 %v1185_v13, %v1017_v5 }
0x120e   :  { %v1193_v63 = vsel %vm45_vm0, %v1189_v15, 0.0 }
0x120f   :  { %1194 = vadd.xlane.f32.xlu0 %v1193_v63 }
0x1294   :  { %v1192_v1 = vpop.xlane.xlu0 %1191 }
0x1295   :  { %v1196_v3 = vmul.f32 0.03125, %v1192_v1 }
0x1297   :  { %v1198_v4 = vsub.f32 %v1188_v59, %v1196_v3 }
0x1298   :  { %v1195_v8 = vpop.xlane.xlu0 %1194 }
0x1299   :  { %v1197_v9 = vmul.f32 0.03125, %v1195_v8  ;;  %v1200_v36 = vmul.f32 %v1198_v4, %v1198_v4 }
0x129b   :  { %v1199_v10 = vsub.f32 %v1189_v15, %v1197_v9  ;;  %v1202_v11 = vsel %vm45_vm0, %v1200_v36, 0.0 }
0x129c   :  { %1203 = vadd.xlane.f32.xlu0 %v1202_v11 }
0x129d   :  { %v1201_v12 = vmul.f32 %v1199_v10, %v1199_v10 }
0x129f   :  { %v1205_v16 = vsel %vm45_vm0, %v1201_v12, 0.0 }
0x12a0   :  { %1206 = vadd.xlane.f32.xlu0 %v1205_v16 }
0x1325   :  { %v1204_v19 = vpop.xlane.xlu0 %1203 }
0x1326   :  { %v1208_v20 = vmul.f32 0.03125, %v1204_v19 }
0x1328   :  { %v1210_v21 = vadd.f32 1e-05, %v1208_v20 }
0x1329   :  { %v1207_v22 = vpop.xlane.xlu0 %1206 }
0x132a   :  { %1616 = vrsqrt.f32 %v1210_v21  ;;  %v1209_v5 = vmul.f32 0.03125, %v1207_v22 }
0x132c   :  { %v1211_v23 = vadd.f32 1e-05, %v1209_v5 }
0x132e   :  { %1618 = vrsqrt.f32 %v1211_v23 }
0x1337   :  { %v1617_v30 = vpop.eup %1616 }
0x1338   :  { %v1214_v43 = vmul.f32 %v1617_v30, %v1198_v4 }
0x133a   :  { %v1220_v29 = vmul.f32 %v1219_v26, %v1214_v43 }
0x133b   :  { %v1619_v27 = vpop.eup %1618 }
0x133c   :  { %v1215_v28 = vmul.f32 %v1619_v27, %v1199_v10  ;;  %v1226_v31 = vadd.f32 %v1225_v14, %v1220_v29 }
0x133e   :  { %v1221_v37 = vmul.f32 %v1219_v26, %v1215_v28 }
0x1340   :  { %v1227_v32 = vadd.f32 %v1225_v14, %v1221_v37 }
0x1342   :  { %v1228_v33 = vpack.c.bf16 %v1227_v32, %v1226_v31 }
0x1344   :  { %1529 = vmatmul.mubr.msk.bf16.vlgmr.msra.gmra.mxu1 %vm45_vm0, %v1228_v33 }
0x1404   :  { %v1289_v35 = vpop.f32.mrf.mxu1 }
0x1405   :  { %v1290_v38 = vadd.f32 %v1379_v34, %v1289_v35 }
0x1406   :  { %v1530_v0 = vpop.f32.mrf.mxu1 }
0x1407   :  { %v1383_v39 = vmul.f32 -1.442695, %v1290_v38 }
0x1408   :  { %v1292_v40 = vpop.f32.mrf.mxu1 }
0x1409   :  { %1620 = vpow2.f32 %v1383_v39  ;;  %v1293_v41 = vadd.f32 %v1379_v34, %v1292_v40 }
0x140a   :  { %v1531_v24 = vpop.f32.mrf.mxu1 }
0x140b   :  { %v1384_v42 = vmul.f32 -1.442695, %v1293_v41 }
0x140d   :  { %1622 = vpow2.f32 %v1384_v42 }
0x1416   :  { %v1621_v7 = vpop.eup %1620 }
0x1417   :  { %v1302_v47 = vadd.f32 1.0, %v1621_v7 }
0x1419   :  { %1624 = vrcp.f32 %v1302_v47 }
0x141a   :  { %v1623_v45 = vpop.eup %1622 }
0x141b   :  { %v1303_v48 = vadd.f32 1.0, %v1623_v45 }
0x141d   :  { %1626 = vrcp.f32 %v1303_v48 }
0x1426   :  { %v1625_v49 = vpop.eup %1624 }
0x1427   :  { %1308 = vst [vmem:[%s2032_s12] sm:$0xff] %v1625_v49 }
0x142a   :  { %v1627_v44 = vpop.eup %1626 }
0x142b   :  { %1309 = vst [vmem:[%s2032_s12 + $0x8] sm:$0xff] %v1627_v44 }

</bundles_post_ra>
